<compile_context>
chip_gen: v7x
topology: tpu7x:2x2x1
jax: 0.10.0
libtpu: 0.0.40
codegen_flags: <defaults>
</compile_context>

<pallas_src>
from functools import partial

import jax
import jax.numpy as jnp
from jax.experimental import pallas as pl
from jax.experimental.pallas import tpu as pltpu


# --------------------------------------------------------------------------
# helpers
# --------------------------------------------------------------------------
def _round_up(x, m):
    return ((x + m - 1) // m) * m


def _pick_v_tile(Vp, Hp, *, prefer_even_tiles, itemsize=2, budget=16 << 20):
    """Largest lane-dense tile width (multiple of 128 that divides Vp) whose
    double-buffered bf16 w_lin block stays under the VMEM budget.  When
    prefer_even_tiles is set (split / "parallel" path), prefer an even tile
    count >= 2 so the V axis balances across two TensorCores (v7x)."""
    n128 = Vp // 128
    divisors = [m for m in range(1, n128 + 1) if n128 % m == 0]
    fits = [m for m in divisors if 2 * Hp * m * 128 * itemsize <= budget]
    if not fits:
        fits = [1]
    if prefer_even_tiles:
        even = [m for m in fits if (n128 // m) % 2 == 0 and (n128 // m) >= 2]
        if even:
            return max(even) * 128
    return max(fits) * 128


def _vmem_limit_bytes(T, Ep, Hp, tn):
    """Generous VMEM estimate: every buffer double-buffered + scratch + slack,
    floored at the 32 MiB scoped default and capped below v7x's 64 MiB."""
    resident = (T * Ep * 4 + Ep * 3 * Hp * 4 + Hp * 3 * Hp * 4
                + 2 * 3 * Hp * 4 + T * Hp * 4)
    tiled = Hp * tn * 2 + tn * 4 + T * tn * 4
    total = 2 * (resident + tiled) + T * Hp * 4 + (8 << 20)
    return int(min(max(total, 32 << 20), 60 << 20))


# --------------------------------------------------------------------------
# kernels
# --------------------------------------------------------------------------
def _recurrence_body(emb_ref, wih_ref, bih_ref, whh_ref, bhh_ref, hs_ref):
    """Single-layer GRU recurrence, batch=1, h0=0, gate order (r, z, n).

    emb_ref: (T, Ep)   wih_ref: (Ep, 3Hp)  bih_ref: (1, 3Hp)
    whh_ref: (Hp, 3Hp) bhh_ref: (1, 3Hp)   hs_ref:  (T, Hp) (written)
    Each gate group is Hp wide (multiple of 128) -> lane-offset-0 slices.
    """
    T = emb_ref.shape[0]
    Hp = whh_ref.shape[0]

    # One fused MXU matmul for all timesteps and all three gates.
    xg = (jnp.dot(emb_ref[...], wih_ref[...],
                  preferred_element_type=jnp.float32) + bih_ref[...])

    whh = whh_ref[...]
    bhh = bhh_ref[...]

    h = jnp.zeros((1, Hp), jnp.float32)
    # Static unroll: T is small/known at trace time; per-step stores use the
    # otherwise-idle vst slot and keep only one hidden state live (no spills
    # at larger T, unlike a trailing concatenate of all steps).
    for t in range(T):
        xg_t = xg[t:t + 1, :]                                   # (1, 3Hp) static
        hg = jnp.dot(h, whh, preferred_element_type=jnp.float32) + bhh
        g = xg_t + hg                                           # one add, then slice
        r = jax.nn.sigmoid(g[:, 0:Hp])
        z = jax.nn.sigmoid(g[:, Hp:2 * Hp])
        n = jnp.tanh(xg_t[:, 2 * Hp:3 * Hp] + r * hg[:, 2 * Hp:3 * Hp])
        h = n + z * (h - n)                                     # == (1-z)*n + z*h
        hs_ref[t:t + 1, :] = h


def _gru_fused_kernel(emb_ref, wih_ref, bih_ref, whh_ref, bhh_ref,
                      wlin_ref, blin_ref, out_ref, hs_ref):
    """Fused kernel: grid over lane-dense V tiles ("arbitrary").

    Iteration 0 runs the sequential recurrence into VMEM scratch hs_ref; every
    iteration projects its bf16 w_lin tile from that scratch (f32 MXU acc)."""
    @pl.when(pl.program_id(0) == 0)
    def _():
        _recurrence_body(emb_ref, wih_ref, bih_ref, whh_ref, bhh_ref, hs_ref)

    hs_bf16 = hs_ref[...].astype(jnp.bfloat16)
    out_ref[...] = (jnp.dot(hs_bf16, wlin_ref[...],
                            preferred_element_type=jnp.float32)
                    + blin_ref[...])


def _gru_recurrence_kernel(emb_ref, wih_ref, bih_ref, whh_ref, bhh_ref, hs_ref):
    _recurrence_body(emb_ref, wih_ref, bih_ref, whh_ref, bhh_ref, hs_ref)


def _vocab_proj_kernel(hs_ref, wlin_ref, blin_ref, out_ref):
    """out = hs @ w_lin + b_lin on one lane-dense V tile (bf16 operands)."""
    out_ref[...] = (jnp.dot(hs_ref[...], wlin_ref[...],
                            preferred_element_type=jnp.float32)
                    + blin_ref[...])


# --------------------------------------------------------------------------
# forward wrapper
# --------------------------------------------------------------------------
@partial(jax.jit, static_argnames=("vocab_size", "fuse"))
def rnn_gru_forward(features, caption, params, *, vocab_size, fuse=True):
    """features: (1, E) float32; caption: (T_cap,) int32; params: pack_params().
    Returns logits of shape (T_cap + 1, vocab_size)."""
    emb_table = params["emb_table"]
    w_ih, b_ih = params["w_ih"], params["b_ih"]
    w_hh, b_hh = params["w_hh"], params["b_hh"]
    w_lin, b_lin = params["w_lin"], params["b_lin"]

    Ep = emb_table.shape[1]
    Hp = w_hh.shape[0]
    Vp = w_lin.shape[1]

    # --- plain-JAX glue: embedding gather + concat + pad to lane-dense Ep ---
    embeds = emb_table[caption].astype(jnp.float32)              # (T_cap, Ep)
    feats = features.astype(jnp.float32)
    feats = jnp.pad(feats, ((0, 0), (0, Ep - feats.shape[1])))   # (1, Ep)
    embeds = jnp.concatenate([feats, embeds], axis=0)            # (T, Ep)
    T = embeds.shape[0]

    tn = _pick_v_tile(Vp, Hp, prefer_even_tiles=not fuse)
    n_tiles = Vp // tn
    vmem_limit = _vmem_limit_bytes(T, Ep, Hp, tn)
    vmem = pl.BlockSpec(memory_space=pltpu.MemorySpace.VMEM)

    if fuse:
        # Single pallas_call: recurrence at grid step 0 into VMEM scratch,
        # lane-dense bf16 projection tile every step.  Saves a launch and the
        # hs HBM round-trip (best on single-TC v5e/v6e and at small V).
        logits_p = pl.pallas_call(
            _gru_fused_kernel,
            out_shape=jax.ShapeDtypeStruct((T, Vp), jnp.float32),
            grid_spec=pltpu.PrefetchScalarGridSpec(
                num_scalar_prefetch=0,
                grid=(n_tiles,),
                in_specs=[pl.BlockSpec((T, Ep), lambda j: (0, 0)),
                          pl.BlockSpec((Ep, 3 * Hp), lambda j: (0, 0)),
                          pl.BlockSpec((1, 3 * Hp), lambda j: (0, 0)),
                          pl.BlockSpec((Hp, 3 * Hp), lambda j: (0, 0)),
                          pl.BlockSpec((1, 3 * Hp), lambda j: (0, 0)),
                          pl.BlockSpec((Hp, tn), lambda j: (0, j)),
                          pl.BlockSpec((1, tn), lambda j: (0, j))],
                out_specs=pl.BlockSpec((T, tn), lambda j: (0, j)),
                scratch_shapes=[pltpu.VMEM((T, Hp), jnp.float32)]),
            compiler_params=pltpu.CompilerParams(
                dimension_semantics=("arbitrary",),
                vmem_limit_bytes=vmem_limit),
        )(embeds, w_ih, b_ih, w_hh, b_hh, w_lin, b_lin)
    else:
        # Split path (v7x / large V): sequential recurrence kernel, then a
        # "parallel"-gridded projection so V tiles can shard across both TCs.
        hs = pl.pallas_call(
            _gru_recurrence_kernel,
            out_shape=jax.ShapeDtypeStruct((T, Hp), jnp.float32),
            in_specs=[vmem] * 5,
            out_specs=vmem,
        )(embeds, w_ih, b_ih, w_hh, b_hh)

        hs_bf16 = hs.astype(jnp.bfloat16)     # halve hs bytes streamed per tile
        logits_p = pl.pallas_call(
            _vocab_proj_kernel,
            out_shape=jax.ShapeDtypeStruct((T, Vp), jnp.float32),
            grid_spec=pltpu.PrefetchScalarGridSpec(
                num_scalar_prefetch=0,
                grid=(n_tiles,),
                in_specs=[pl.BlockSpec((T, Hp), lambda j: (0, 0)),
                          pl.BlockSpec((Hp, tn), lambda j: (0, j)),
                          pl.BlockSpec((1, tn), lambda j: (0, j))],
                out_specs=pl.BlockSpec((T, tn), lambda j: (0, j))),
            compiler_params=pltpu.CompilerParams(
                dimension_semantics=("parallel",),
                vmem_limit_bytes=vmem_limit),
        )(hs_bf16, w_lin, b_lin)

    return logits_p[:, :vocab_size]


# --------------------------------------------------------------------------
# parameters
# --------------------------------------------------------------------------
def init_params(key, embedding_dim, hidden_dim, vocab_size):
    """Deterministic synthetic init mirroring the PyTorch module's __init__.

    Logical (unpadded) layout, GRU weights pre-transposed and gate-fused so the
    kernel computes x @ W directly: w_ih (E, 3H), w_hh (H, 3H), biases (1, 3H),
    gate order (r, z, n) matching nn.GRU."""
    keys = jax.random.split(key, 6)
    k = 1.0 / jnp.sqrt(jnp.float32(hidden_dim))
    # nn.Embedding weight ~ U(-0.1, 0.1) (per init_weights)
    emb_table = jax.random.uniform(keys[0], (vocab_size, embedding_dim),
                                   jnp.float32, -0.1, 0.1)
    # nn.GRU default init ~ U(-1/sqrt(H), 1/sqrt(H)), fused gate layout.
    w_ih = jax.random.uniform(keys[1], (embedding_dim, 3 * hidden_dim),
                              jnp.float32, -k, k)
    w_hh = jax.random.uniform(keys[2], (hidden_dim, 3 * hidden_dim),
                              jnp.float32, -k, k)
    b_ih = jax.random.uniform(keys[3], (1, 3 * hidden_dim), jnp.float32, -k, k)
    b_hh = jax.random.uniform(keys[4], (1, 3 * hidden_dim), jnp.float32, -k, k)
    # nn.Linear(hidden, vocab): weight ~ U(-0.1, 0.1), bias = 0 (per init_weights)
    w_lin = jax.random.uniform(keys[5], (hidden_dim, vocab_size),
                               jnp.float32, -0.1, 0.1)
    b_lin = jnp.zeros((1, vocab_size), jnp.float32)
    return dict(emb_table=emb_table, w_ih=w_ih, b_ih=b_ih,
                w_hh=w_hh, b_hh=b_hh, w_lin=w_lin, b_lin=b_lin)


def pack_params(p, *, lane=128):
    """Pack logical params into the TPU kernel layout:
      * E -> Ep, H -> Hp, V -> Vp (multiples of 128, lane-dense),
      * each GRU gate group padded to Hp columns (gate-aligned slices),
      * w_lin cast to bfloat16 (memory-bound projection; f32 MXU accumulate).
    Zero padding keeps padded hidden lanes exactly 0 through the recurrence."""
    E, H = p["w_ih"].shape[0], p["w_hh"].shape[0]
    V = p["w_lin"].shape[1]
    Ep, Hp, Vp = _round_up(E, lane), _round_up(H, lane), _round_up(V, lane)

    def pad_gate_cols(w, rows_out):
        rows = w.shape[0]
        g = w.reshape(rows, 3, H)
        g = jnp.pad(g, ((0, rows_out - rows), (0, 0), (0, Hp - H)))
        return g.reshape(rows_out, 3 * Hp).astype(jnp.float32)

    return dict(
        emb_table=jnp.pad(p["emb_table"],
                          ((0, 0), (0, Ep - E))).astype(jnp.float32),
        w_ih=pad_gate_cols(p["w_ih"], Ep),
        b_ih=pad_gate_cols(p["b_ih"], 1),
        w_hh=pad_gate_cols(p["w_hh"], Hp),
        b_hh=pad_gate_cols(p["b_hh"], 1),
        w_lin=jnp.pad(p["w_lin"],
                      ((0, Hp - H), (0, Vp - V))).astype(jnp.bfloat16),
        b_lin=jnp.pad(p["b_lin"], ((0, 0), (0, Vp - V))).astype(jnp.float32),
    )


# --------------------------------------------------------------------------
# pure-JAX reference (f32, unpadded) for correctness checking
# --------------------------------------------------------------------------
def rnn_gru_reference(features, caption, p):
    H = p["w_hh"].shape[0]
    embeds = p["emb_table"][caption]
    embeds = jnp.concatenate([features, embeds], 0).astype(jnp.float32)

    def step(h, x):
        xg = x @ p["w_ih"] + p["b_ih"][0]
        hg = h @ p["w_hh"] + p["b_hh"][0]
        r = jax.nn.sigmoid(xg[0:H] + hg[0:H])
        z = jax.nn.sigmoid(xg[H:2 * H] + hg[H:2 * H])
        n = jnp.tanh(xg[2 * H:] + r * hg[2 * H:])
        h_new = (1.0 - z) * n + z * h
        return h_new, h_new

    h0 = jnp.zeros((H,), jnp.float32)
    _, hs = jax.lax.scan(step, h0, embeds)
    return hs @ p["w_lin"] + p["b_lin"]


# --------------------------------------------------------------------------
if __name__ == "__main__":
    embedding_dim = 32
    hidden_dim = 32
    vocab_size = 128
    caption_len = 7           # -> seq_length = 8

    key = jax.random.PRNGKey(0)
    k_param, k_feat, k_cap = jax.random.split(key, 3)

    logical_params = init_params(k_param, embedding_dim, hidden_dim, vocab_size)
    packed_params = pack_params(logical_params)

    features = jax.random.normal(k_feat, (1, embedding_dim), jnp.float32)
    caption = jax.random.randint(k_cap, (caption_len,), 0, vocab_size, jnp.int32)

    # Fused single-call path (default; best for latency / single-TC chips).
    logits_fused = rnn_gru_forward(features, caption, packed_params,
                                   vocab_size=vocab_size, fuse=True)
    # Split path (recurrence kernel + "parallel" V-tiled projection, for v7x).
    logits_split = rnn_gru_forward(features, caption, packed_params,
                                   vocab_size=vocab_size, fuse=False)
    jax.block_until_ready((logits_fused, logits_split))

    assert logits_fused.shape == (caption_len + 1, vocab_size)
    assert logits_split.shape == (caption_len + 1, vocab_size)
    assert jnp.allclose(logits_fused, logits_split, atol=1e-3, rtol=1e-3)

    reference = rnn_gru_reference(features, caption, logical_params)
    assert jnp.allclose(logits_fused, reference, atol=5e-2, rtol=5e-2)

    print("KERNEL_OK")
</pallas_src>

<mosaic_0001>
module attributes {stable_mosaic.version = 11 : i64} {
  func.func @_gru_fused_kernel(%arg0: i32, %arg1: memref<8x128xf32, #tpu.memory_space<vmem>>, %arg2: memref<128x384xf32, #tpu.memory_space<vmem>>, %arg3: memref<1x384xf32, #tpu.memory_space<vmem>>, %arg4: memref<128x384xf32, #tpu.memory_space<vmem>>, %arg5: memref<1x384xf32, #tpu.memory_space<vmem>>, %arg6: memref<128x128xbf16, #tpu.memory_space<vmem>>, %arg7: memref<1x128xf32, #tpu.memory_space<vmem>>, %arg8: memref<8x128xf32, #tpu.memory_space<vmem>>, %arg9: memref<8x128xf32, #tpu.memory_space<vmem>>) attributes {dimension_semantics = [#tpu.dimension_semantics<arbitrary>], iteration_bounds = array<i64: 1>, scalar_prefetch = 0 : i64, scratch_operands = 1 : i64, tpu.core_type = #tpu.core_type<tc>, window_params = [{pipeline_mode = #tpu.pipeline_mode<synchronous>, transform_indices = @transform_0, window_bounds = array<i64: 8, 128>}, {pipeline_mode = #tpu.pipeline_mode<synchronous>, transform_indices = @transform_1, window_bounds = array<i64: 128, 384>}, {pipeline_mode = #tpu.pipeline_mode<synchronous>, transform_indices = @transform_2, window_bounds = array<i64: 1, 384>}, {pipeline_mode = #tpu.pipeline_mode<synchronous>, transform_indices = @transform_3, window_bounds = array<i64: 128, 384>}, {pipeline_mode = #tpu.pipeline_mode<synchronous>, transform_indices = @transform_4, window_bounds = array<i64: 1, 384>}, {transform_indices = @transform_5, window_bounds = array<i64: 128, 128>}, {transform_indices = @transform_6, window_bounds = array<i64: 1, 128>}, {transform_indices = @transform_7, window_bounds = array<i64: 8, 128>}]} {
    %c0_i32 = arith.constant 0 : i32
    %0 = arith.cmpi eq, %arg0, %c0_i32 : i32
    %1 = arith.extui %0 : i1 to i32
    %c0_i32_0 = arith.constant 0 : i32
    %2 = arith.cmpi ne, %1, %c0_i32_0 : i32
    scf.if %2 {
      %c0_8 = arith.constant 0 : index
      %c0_9 = arith.constant 0 : index
      %11 = vector.load %arg1[%c0_8, %c0_9] : memref<8x128xf32, #tpu.memory_space<vmem>>, vector<8x128xf32>
      %c0_10 = arith.constant 0 : index
      %c0_11 = arith.constant 0 : index
      %12 = vector.load %arg2[%c0_10, %c0_11] : memref<128x384xf32, #tpu.memory_space<vmem>>, vector<128x384xf32>
      %cst_12 = arith.constant dense<0.000000e+00> : vector<8x384xf32>
      %13 = tpu.matmul %11, %12, %cst_12 {dimension_numbers = #tpu.dot_dimension_numbers<[1], [0], [0], [1], [0, 0, 1, 1], [], []>} : vector<8x128xf32>, vector<128x384xf32>, vector<8x384xf32> -> vector<8x384xf32>
      %c0_13 = arith.constant 0 : index
      %c0_14 = arith.constant 0 : index
      %14 = vector.load %arg3[%c0_13, %c0_14] : memref<1x384xf32, #tpu.memory_space<vmem>>, vector<1x384xf32>
      %15 = vector.broadcast %14 : vector<1x384xf32> to vector<8x384xf32>
      %16 = arith.addf %13, %15 : vector<8x384xf32>
      %c0_15 = arith.constant 0 : index
      %c0_16 = arith.constant 0 : index
      %17 = vector.load %arg4[%c0_15, %c0_16] : memref<128x384xf32, #tpu.memory_space<vmem>>, vector<128x384xf32>
      %c0_17 = arith.constant 0 : index
      %c0_18 = arith.constant 0 : index
      %18 = vector.load %arg5[%c0_17, %c0_18] : memref<1x384xf32, #tpu.memory_space<vmem>>, vector<1x384xf32>
      %cst_19 = arith.constant 0.000000e+00 : f32
      %19 = vector.broadcast %cst_19 : f32 to vector<1x128xf32>
      %20 = vector.extract_strided_slice %16 {offsets = [0, 0], sizes = [1, 384], strides = [1, 1]} : vector<8x384xf32> to vector<1x384xf32>
      %cst_20 = arith.constant dense<0.000000e+00> : vector<1x384xf32>
      %21 = tpu.matmul %19, %17, %cst_20 {dimension_numbers = #tpu.dot_dimension_numbers<[1], [0], [0], [1], [0, 0, 1, 1], [], []>} : vector<1x128xf32>, vector<128x384xf32>, vector<1x384xf32> -> vector<1x384xf32>
      %22 = arith.addf %21, %18 : vector<1x384xf32>
      %23 = arith.addf %20, %22 : vector<1x384xf32>
      %24 = vector.extract_strided_slice %23 {offsets = [0, 0], sizes = [1, 128], strides = [1, 1]} : vector<1x384xf32> to vector<1x128xf32>
      %25 = arith.negf %24 : vector<1x128xf32>
      %26 = math.exp %25 : vector<1x128xf32>
      %cst_21 = arith.constant 1.000000e+00 : f32
      %27 = vector.broadcast %cst_21 : f32 to vector<1x128xf32>
      %28 = arith.addf %27, %26 : vector<1x128xf32>
      %29 = arith.divf %27, %28 : vector<1x128xf32>
      %30 = vector.extract_strided_slice %23 {offsets = [0, 128], sizes = [1, 128], strides = [1, 1]} : vector<1x384xf32> to vector<1x128xf32>
      %31 = arith.negf %30 : vector<1x128xf32>
      %32 = math.exp %31 : vector<1x128xf32>
      %cst_22 = arith.constant 1.000000e+00 : f32
      %33 = vector.broadcast %cst_22 : f32 to vector<1x128xf32>
      %34 = arith.addf %33, %32 : vector<1x128xf32>
      %35 = arith.divf %33, %34 : vector<1x128xf32>
      %36 = vector.extract_strided_slice %20 {offsets = [0, 256], sizes = [1, 128], strides = [1, 1]} : vector<1x384xf32> to vector<1x128xf32>
      %37 = vector.extract_strided_slice %22 {offsets = [0, 256], sizes = [1, 128], strides = [1, 1]} : vector<1x384xf32> to vector<1x128xf32>
      %38 = arith.mulf %29, %37 : vector<1x128xf32>
      %39 = arith.addf %36, %38 : vector<1x128xf32>
      %40 = math.tanh %39 : vector<1x128xf32>
      %41 = arith.subf %19, %40 : vector<1x128xf32>
      %42 = arith.mulf %35, %41 : vector<1x128xf32>
      %43 = arith.addf %40, %42 : vector<1x128xf32>
      %c0_23 = arith.constant 0 : index
      %c0_24 = arith.constant 0 : index
      %44 = vector.load %arg9[%c0_23, %c0_24] : memref<8x128xf32, #tpu.memory_space<vmem>>, vector<1x128xf32>
      tpu.vector_store %arg9[%c0_23, %c0_24], %43 {strides = array<i32>} : memref<8x128xf32, #tpu.memory_space<vmem>>, vector<1x128xf32>,
      %45 = vector.extract_strided_slice %16 {offsets = [1, 0], sizes = [1, 384], strides = [1, 1]} : vector<8x384xf32> to vector<1x384xf32>
      %cst_25 = arith.constant dense<0.000000e+00> : vector<1x384xf32>
      %46 = tpu.matmul %43, %17, %cst_25 {dimension_numbers = #tpu.dot_dimension_numbers<[1], [0], [0], [1], [0, 0, 1, 1], [], []>} : vector<1x128xf32>, vector<128x384xf32>, vector<1x384xf32> -> vector<1x384xf32>
      %47 = arith.addf %46, %18 : vector<1x384xf32>
      %48 = arith.addf %45, %47 : vector<1x384xf32>
      %49 = vector.extract_strided_slice %48 {offsets = [0, 0], sizes = [1, 128], strides = [1, 1]} : vector<1x384xf32> to vector<1x128xf32>
      %50 = arith.negf %49 : vector<1x128xf32>
      %51 = math.exp %50 : vector<1x128xf32>
      %cst_26 = arith.constant 1.000000e+00 : f32
      %52 = vector.broadcast %cst_26 : f32 to vector<1x128xf32>
      %53 = arith.addf %52, %51 : vector<1x128xf32>
      %54 = arith.divf %52, %53 : vector<1x128xf32>
      %55 = vector.extract_strided_slice %48 {offsets = [0, 128], sizes = [1, 128], strides = [1, 1]} : vector<1x384xf32> to vector<1x128xf32>
      %56 = arith.negf %55 : vector<1x128xf32>
      %57 = math.exp %56 : vector<1x128xf32>
      %cst_27 = arith.constant 1.000000e+00 : f32
      %58 = vector.broadcast %cst_27 : f32 to vector<1x128xf32>
      %59 = arith.addf %58, %57 : vector<1x128xf32>
      %60 = arith.divf %58, %59 : vector<1x128xf32>
      %61 = vector.extract_strided_slice %45 {offsets = [0, 256], sizes = [1, 128], strides = [1, 1]} : vector<1x384xf32> to vector<1x128xf32>
      %62 = vector.extract_strided_slice %47 {offsets = [0, 256], sizes = [1, 128], strides = [1, 1]} : vector<1x384xf32> to vector<1x128xf32>
      %63 = arith.mulf %54, %62 : vector<1x128xf32>
      %64 = arith.addf %61, %63 : vector<1x128xf32>
      %65 = math.tanh %64 : vector<1x128xf32>
      %66 = arith.subf %43, %65 : vector<1x128xf32>
      %67 = arith.mulf %60, %66 : vector<1x128xf32>
      %68 = arith.addf %65, %67 : vector<1x128xf32>
      %c1 = arith.constant 1 : index
      %c0_28 = arith.constant 0 : index
      %69 = vector.load %arg9[%c1, %c0_28] : memref<8x128xf32, #tpu.memory_space<vmem>>, vector<1x128xf32>
      tpu.vector_store %arg9[%c1, %c0_28], %68 {strides = array<i32>} : memref<8x128xf32, #tpu.memory_space<vmem>>, vector<1x128xf32>,
      %70 = vector.extract_strided_slice %16 {offsets = [2, 0], sizes = [1, 384], strides = [1, 1]} : vector<8x384xf32> to vector<1x384xf32>
      %cst_29 = arith.constant dense<0.000000e+00> : vector<1x384xf32>
      %71 = tpu.matmul %68, %17, %cst_29 {dimension_numbers = #tpu.dot_dimension_numbers<[1], [0], [0], [1], [0, 0, 1, 1], [], []>} : vector<1x128xf32>, vector<128x384xf32>, vector<1x384xf32> -> vector<1x384xf32>
      %72 = arith.addf %71, %18 : vector<1x384xf32>
      %73 = arith.addf %70, %72 : vector<1x384xf32>
      %74 = vector.extract_strided_slice %73 {offsets = [0, 0], sizes = [1, 128], strides = [1, 1]} : vector<1x384xf32> to vector<1x128xf32>
      %75 = arith.negf %74 : vector<1x128xf32>
      %76 = math.exp %75 : vector<1x128xf32>
      %cst_30 = arith.constant 1.000000e+00 : f32
      %77 = vector.broadcast %cst_30 : f32 to vector<1x128xf32>
      %78 = arith.addf %77, %76 : vector<1x128xf32>
      %79 = arith.divf %77, %78 : vector<1x128xf32>
      %80 = vector.extract_strided_slice %73 {offsets = [0, 128], sizes = [1, 128], strides = [1, 1]} : vector<1x384xf32> to vector<1x128xf32>
      %81 = arith.negf %80 : vector<1x128xf32>
      %82 = math.exp %81 : vector<1x128xf32>
      %cst_31 = arith.constant 1.000000e+00 : f32
      %83 = vector.broadcast %cst_31 : f32 to vector<1x128xf32>
      %84 = arith.addf %83, %82 : vector<1x128xf32>
      %85 = arith.divf %83, %84 : vector<1x128xf32>
      %86 = vector.extract_strided_slice %70 {offsets = [0, 256], sizes = [1, 128], strides = [1, 1]} : vector<1x384xf32> to vector<1x128xf32>
      %87 = vector.extract_strided_slice %72 {offsets = [0, 256], sizes = [1, 128], strides = [1, 1]} : vector<1x384xf32> to vector<1x128xf32>
      %88 = arith.mulf %79, %87 : vector<1x128xf32>
      %89 = arith.addf %86, %88 : vector<1x128xf32>
      %90 = math.tanh %89 : vector<1x128xf32>
      %91 = arith.subf %68, %90 : vector<1x128xf32>
      %92 = arith.mulf %85, %91 : vector<1x128xf32>
      %93 = arith.addf %90, %92 : vector<1x128xf32>
      %c2 = arith.constant 2 : index
      %c0_32 = arith.constant 0 : index
      %94 = vector.load %arg9[%c2, %c0_32] : memref<8x128xf32, #tpu.memory_space<vmem>>, vector<1x128xf32>
      tpu.vector_store %arg9[%c2, %c0_32], %93 {strides = array<i32>} : memref<8x128xf32, #tpu.memory_space<vmem>>, vector<1x128xf32>,
      %95 = vector.extract_strided_slice %16 {offsets = [3, 0], sizes = [1, 384], strides = [1, 1]} : vector<8x384xf32> to vector<1x384xf32>
      %cst_33 = arith.constant dense<0.000000e+00> : vector<1x384xf32>
      %96 = tpu.matmul %93, %17, %cst_33 {dimension_numbers = #tpu.dot_dimension_numbers<[1], [0], [0], [1], [0, 0, 1, 1], [], []>} : vector<1x128xf32>, vector<128x384xf32>, vector<1x384xf32> -> vector<1x384xf32>
      %97 = arith.addf %96, %18 : vector<1x384xf32>
      %98 = arith.addf %95, %97 : vector<1x384xf32>
      %99 = vector.extract_strided_slice %98 {offsets = [0, 0], sizes = [1, 128], strides = [1, 1]} : vector<1x384xf32> to vector<1x128xf32>
      %100 = arith.negf %99 : vector<1x128xf32>
      %101 = math.exp %100 : vector<1x128xf32>
      %cst_34 = arith.constant 1.000000e+00 : f32
      %102 = vector.broadcast %cst_34 : f32 to vector<1x128xf32>
      %103 = arith.addf %102, %101 : vector<1x128xf32>
      %104 = arith.divf %102, %103 : vector<1x128xf32>
      %105 = vector.extract_strided_slice %98 {offsets = [0, 128], sizes = [1, 128], strides = [1, 1]} : vector<1x384xf32> to vector<1x128xf32>
      %106 = arith.negf %105 : vector<1x128xf32>
      %107 = math.exp %106 : vector<1x128xf32>
      %cst_35 = arith.constant 1.000000e+00 : f32
      %108 = vector.broadcast %cst_35 : f32 to vector<1x128xf32>
      %109 = arith.addf %108, %107 : vector<1x128xf32>
      %110 = arith.divf %108, %109 : vector<1x128xf32>
      %111 = vector.extract_strided_slice %95 {offsets = [0, 256], sizes = [1, 128], strides = [1, 1]} : vector<1x384xf32> to vector<1x128xf32>
      %112 = vector.extract_strided_slice %97 {offsets = [0, 256], sizes = [1, 128], strides = [1, 1]} : vector<1x384xf32> to vector<1x128xf32>
      %113 = arith.mulf %104, %112 : vector<1x128xf32>
      %114 = arith.addf %111, %113 : vector<1x128xf32>
      %115 = math.tanh %114 : vector<1x128xf32>
      %116 = arith.subf %93, %115 : vector<1x128xf32>
      %117 = arith.mulf %110, %116 : vector<1x128xf32>
      %118 = arith.addf %115, %117 : vector<1x128xf32>
      %c3 = arith.constant 3 : index
      %c0_36 = arith.constant 0 : index
      %119 = vector.load %arg9[%c3, %c0_36] : memref<8x128xf32, #tpu.memory_space<vmem>>, vector<1x128xf32>
      tpu.vector_store %arg9[%c3, %c0_36], %118 {strides = array<i32>} : memref<8x128xf32, #tpu.memory_space<vmem>>, vector<1x128xf32>,
      %120 = vector.extract_strided_slice %16 {offsets = [4, 0], sizes = [1, 384], strides = [1, 1]} : vector<8x384xf32> to vector<1x384xf32>
      %cst_37 = arith.constant dense<0.000000e+00> : vector<1x384xf32>
      %121 = tpu.matmul %118, %17, %cst_37 {dimension_numbers = #tpu.dot_dimension_numbers<[1], [0], [0], [1], [0, 0, 1, 1], [], []>} : vector<1x128xf32>, vector<128x384xf32>, vector<1x384xf32> -> vector<1x384xf32>
      %122 = arith.addf %121, %18 : vector<1x384xf32>
      %123 = arith.addf %120, %122 : vector<1x384xf32>
      %124 = vector.extract_strided_slice %123 {offsets = [0, 0], sizes = [1, 128], strides = [1, 1]} : vector<1x384xf32> to vector<1x128xf32>
      %125 = arith.negf %124 : vector<1x128xf32>
      %126 = math.exp %125 : vector<1x128xf32>
      %cst_38 = arith.constant 1.000000e+00 : f32
      %127 = vector.broadcast %cst_38 : f32 to vector<1x128xf32>
      %128 = arith.addf %127, %126 : vector<1x128xf32>
      %129 = arith.divf %127, %128 : vector<1x128xf32>
      %130 = vector.extract_strided_slice %123 {offsets = [0, 128], sizes = [1, 128], strides = [1, 1]} : vector<1x384xf32> to vector<1x128xf32>
      %131 = arith.negf %130 : vector<1x128xf32>
      %132 = math.exp %131 : vector<1x128xf32>
      %cst_39 = arith.constant 1.000000e+00 : f32
      %133 = vector.broadcast %cst_39 : f32 to vector<1x128xf32>
      %134 = arith.addf %133, %132 : vector<1x128xf32>
      %135 = arith.divf %133, %134 : vector<1x128xf32>
      %136 = vector.extract_strided_slice %120 {offsets = [0, 256], sizes = [1, 128], strides = [1, 1]} : vector<1x384xf32> to vector<1x128xf32>
      %137 = vector.extract_strided_slice %122 {offsets = [0, 256], sizes = [1, 128], strides = [1, 1]} : vector<1x384xf32> to vector<1x128xf32>
      %138 = arith.mulf %129, %137 : vector<1x128xf32>
      %139 = arith.addf %136, %138 : vector<1x128xf32>
      %140 = math.tanh %139 : vector<1x128xf32>
      %141 = arith.subf %118, %140 : vector<1x128xf32>
      %142 = arith.mulf %135, %141 : vector<1x128xf32>
      %143 = arith.addf %140, %142 : vector<1x128xf32>
      %c4 = arith.constant 4 : index
      %c0_40 = arith.constant 0 : index
      %144 = vector.load %arg9[%c4, %c0_40] : memref<8x128xf32, #tpu.memory_space<vmem>>, vector<1x128xf32>
      tpu.vector_store %arg9[%c4, %c0_40], %143 {strides = array<i32>} : memref<8x128xf32, #tpu.memory_space<vmem>>, vector<1x128xf32>,
      %145 = vector.extract_strided_slice %16 {offsets = [5, 0], sizes = [1, 384], strides = [1, 1]} : vector<8x384xf32> to vector<1x384xf32>
      %cst_41 = arith.constant dense<0.000000e+00> : vector<1x384xf32>
      %146 = tpu.matmul %143, %17, %cst_41 {dimension_numbers = #tpu.dot_dimension_numbers<[1], [0], [0], [1], [0, 0, 1, 1], [], []>} : vector<1x128xf32>, vector<128x384xf32>, vector<1x384xf32> -> vector<1x384xf32>
      %147 = arith.addf %146, %18 : vector<1x384xf32>
      %148 = arith.addf %145, %147 : vector<1x384xf32>
      %149 = vector.extract_strided_slice %148 {offsets = [0, 0], sizes = [1, 128], strides = [1, 1]} : vector<1x384xf32> to vector<1x128xf32>
      %150 = arith.negf %149 : vector<1x128xf32>
      %151 = math.exp %150 : vector<1x128xf32>
      %cst_42 = arith.constant 1.000000e+00 : f32
      %152 = vector.broadcast %cst_42 : f32 to vector<1x128xf32>
      %153 = arith.addf %152, %151 : vector<1x128xf32>
      %154 = arith.divf %152, %153 : vector<1x128xf32>
      %155 = vector.extract_strided_slice %148 {offsets = [0, 128], sizes = [1, 128], strides = [1, 1]} : vector<1x384xf32> to vector<1x128xf32>
      %156 = arith.negf %155 : vector<1x128xf32>
      %157 = math.exp %156 : vector<1x128xf32>
      %cst_43 = arith.constant 1.000000e+00 : f32
      %158 = vector.broadcast %cst_43 : f32 to vector<1x128xf32>
      %159 = arith.addf %158, %157 : vector<1x128xf32>
      %160 = arith.divf %158, %159 : vector<1x128xf32>
      %161 = vector.extract_strided_slice %145 {offsets = [0, 256], sizes = [1, 128], strides = [1, 1]} : vector<1x384xf32> to vector<1x128xf32>
      %162 = vector.extract_strided_slice %147 {offsets = [0, 256], sizes = [1, 128], strides = [1, 1]} : vector<1x384xf32> to vector<1x128xf32>
      %163 = arith.mulf %154, %162 : vector<1x128xf32>
      %164 = arith.addf %161, %163 : vector<1x128xf32>
      %165 = math.tanh %164 : vector<1x128xf32>
      %166 = arith.subf %143, %165 : vector<1x128xf32>
      %167 = arith.mulf %160, %166 : vector<1x128xf32>
      %168 = arith.addf %165, %167 : vector<1x128xf32>
      %c5 = arith.constant 5 : index
      %c0_44 = arith.constant 0 : index
      %169 = vector.load %arg9[%c5, %c0_44] : memref<8x128xf32, #tpu.memory_space<vmem>>, vector<1x128xf32>
      tpu.vector_store %arg9[%c5, %c0_44], %168 {strides = array<i32>} : memref<8x128xf32, #tpu.memory_space<vmem>>, vector<1x128xf32>,
      %170 = vector.extract_strided_slice %16 {offsets = [6, 0], sizes = [1, 384], strides = [1, 1]} : vector<8x384xf32> to vector<1x384xf32>
      %cst_45 = arith.constant dense<0.000000e+00> : vector<1x384xf32>
      %171 = tpu.matmul %168, %17, %cst_45 {dimension_numbers = #tpu.dot_dimension_numbers<[1], [0], [0], [1], [0, 0, 1, 1], [], []>} : vector<1x128xf32>, vector<128x384xf32>, vector<1x384xf32> -> vector<1x384xf32>
      %172 = arith.addf %171, %18 : vector<1x384xf32>
      %173 = arith.addf %170, %172 : vector<1x384xf32>
      %174 = vector.extract_strided_slice %173 {offsets = [0, 0], sizes = [1, 128], strides = [1, 1]} : vector<1x384xf32> to vector<1x128xf32>
      %175 = arith.negf %174 : vector<1x128xf32>
      %176 = math.exp %175 : vector<1x128xf32>
      %cst_46 = arith.constant 1.000000e+00 : f32
      %177 = vector.broadcast %cst_46 : f32 to vector<1x128xf32>
      %178 = arith.addf %177, %176 : vector<1x128xf32>
      %179 = arith.divf %177, %178 : vector<1x128xf32>
      %180 = vector.extract_strided_slice %173 {offsets = [0, 128], sizes = [1, 128], strides = [1, 1]} : vector<1x384xf32> to vector<1x128xf32>
      %181 = arith.negf %180 : vector<1x128xf32>
      %182 = math.exp %181 : vector<1x128xf32>
      %cst_47 = arith.constant 1.000000e+00 : f32
      %183 = vector.broadcast %cst_47 : f32 to vector<1x128xf32>
      %184 = arith.addf %183, %182 : vector<1x128xf32>
      %185 = arith.divf %183, %184 : vector<1x128xf32>
      %186 = vector.extract_strided_slice %170 {offsets = [0, 256], sizes = [1, 128], strides = [1, 1]} : vector<1x384xf32> to vector<1x128xf32>
      %187 = vector.extract_strided_slice %172 {offsets = [0, 256], sizes = [1, 128], strides = [1, 1]} : vector<1x384xf32> to vector<1x128xf32>
      %188 = arith.mulf %179, %187 : vector<1x128xf32>
      %189 = arith.addf %186, %188 : vector<1x128xf32>
      %190 = math.tanh %189 : vector<1x128xf32>
      %191 = arith.subf %168, %190 : vector<1x128xf32>
      %192 = arith.mulf %185, %191 : vector<1x128xf32>
      %193 = arith.addf %190, %192 : vector<1x128xf32>
      %c6 = arith.constant 6 : index
      %c0_48 = arith.constant 0 : index
      %194 = vector.load %arg9[%c6, %c0_48] : memref<8x128xf32, #tpu.memory_space<vmem>>, vector<1x128xf32>
      tpu.vector_store %arg9[%c6, %c0_48], %193 {strides = array<i32>} : memref<8x128xf32, #tpu.memory_space<vmem>>, vector<1x128xf32>,
      %195 = vector.extract_strided_slice %16 {offsets = [7, 0], sizes = [1, 384], strides = [1, 1]} : vector<8x384xf32> to vector<1x384xf32>
      %cst_49 = arith.constant dense<0.000000e+00> : vector<1x384xf32>
      %196 = tpu.matmul %193, %17, %cst_49 {dimension_numbers = #tpu.dot_dimension_numbers<[1], [0], [0], [1], [0, 0, 1, 1], [], []>} : vector<1x128xf32>, vector<128x384xf32>, vector<1x384xf32> -> vector<1x384xf32>
      %197 = arith.addf %196, %18 : vector<1x384xf32>
      %198 = arith.addf %195, %197 : vector<1x384xf32>
      %199 = vector.extract_strided_slice %198 {offsets = [0, 0], sizes = [1, 128], strides = [1, 1]} : vector<1x384xf32> to vector<1x128xf32>
      %200 = arith.negf %199 : vector<1x128xf32>
      %201 = math.exp %200 : vector<1x128xf32>
      %cst_50 = arith.constant 1.000000e+00 : f32
      %202 = vector.broadcast %cst_50 : f32 to vector<1x128xf32>
      %203 = arith.addf %202, %201 : vector<1x128xf32>
      %204 = arith.divf %202, %203 : vector<1x128xf32>
      %205 = vector.extract_strided_slice %198 {offsets = [0, 128], sizes = [1, 128], strides = [1, 1]} : vector<1x384xf32> to vector<1x128xf32>
      %206 = arith.negf %205 : vector<1x128xf32>
      %207 = math.exp %206 : vector<1x128xf32>
      %cst_51 = arith.constant 1.000000e+00 : f32
      %208 = vector.broadcast %cst_51 : f32 to vector<1x128xf32>
      %209 = arith.addf %208, %207 : vector<1x128xf32>
      %210 = arith.divf %208, %209 : vector<1x128xf32>
      %211 = vector.extract_strided_slice %195 {offsets = [0, 256], sizes = [1, 128], strides = [1, 1]} : vector<1x384xf32> to vector<1x128xf32>
      %212 = vector.extract_strided_slice %197 {offsets = [0, 256], sizes = [1, 128], strides = [1, 1]} : vector<1x384xf32> to vector<1x128xf32>
      %213 = arith.mulf %204, %212 : vector<1x128xf32>
      %214 = arith.addf %211, %213 : vector<1x128xf32>
      %215 = math.tanh %214 : vector<1x128xf32>
      %216 = arith.subf %193, %215 : vector<1x128xf32>
      %217 = arith.mulf %210, %216 : vector<1x128xf32>
      %218 = arith.addf %215, %217 : vector<1x128xf32>
      %c7 = arith.constant 7 : index
      %c0_52 = arith.constant 0 : index
      %219 = vector.load %arg9[%c7, %c0_52] : memref<8x128xf32, #tpu.memory_space<vmem>>, vector<1x128xf32>
      tpu.vector_store %arg9[%c7, %c0_52], %218 {strides = array<i32>} : memref<8x128xf32, #tpu.memory_space<vmem>>, vector<1x128xf32>,
    } else {
    }
    %c0 = arith.constant 0 : index
    %c0_1 = arith.constant 0 : index
    %3 = vector.load %arg9[%c0, %c0_1] : memref<8x128xf32, #tpu.memory_space<vmem>>, vector<8x128xf32>
    %4 = arith.truncf %3 : vector<8x128xf32> to vector<8x128xbf16>
    %c0_2 = arith.constant 0 : index
    %c0_3 = arith.constant 0 : index
    %5 = vector.load %arg6[%c0_2, %c0_3] : memref<128x128xbf16, #tpu.memory_space<vmem>>, vector<128x128xbf16>
    %cst = arith.constant dense<0.000000e+00> : vector<8x128xf32>
    %6 = tpu.matmul %4, %5, %cst {dimension_numbers = #tpu.dot_dimension_numbers<[1], [0], [0], [1], [0, 0, 1, 1], [], []>} : vector<8x128xbf16>, vector<128x128xbf16>, vector<8x128xf32> -> vector<8x128xf32>
    %c0_4 = arith.constant 0 : index
    %c0_5 = arith.constant 0 : index
    %7 = vector.load %arg7[%c0_4, %c0_5] : memref<1x128xf32, #tpu.memory_space<vmem>>, vector<1x128xf32>
    %8 = vector.broadcast %7 : vector<1x128xf32> to vector<8x128xf32>
    %9 = arith.addf %6, %8 : vector<8x128xf32>
    %c0_6 = arith.constant 0 : index
    %c0_7 = arith.constant 0 : index
    %10 = vector.load %arg8[%c0_6, %c0_7] : memref<8x128xf32, #tpu.memory_space<vmem>>, vector<8x128xf32>
    tpu.vector_store %arg8[%c0_6, %c0_7], %9 {strides = array<i32>} : memref<8x128xf32, #tpu.memory_space<vmem>>, vector<8x128xf32>,
    return
  }
  func.func @transform_0(%arg0: i32) -> (i32, i32) {
    %c0_i32 = arith.constant 0 : i32
    %c0_i32_0 = arith.constant 0 : i32
    %c0_i32_1 = arith.constant 0 : i32
    return %c0_i32, %c0_i32_0 : i32, i32
  }
  func.func @transform_1(%arg0: i32) -> (i32, i32) {
    %c0_i32 = arith.constant 0 : i32
    %c0_i32_0 = arith.constant 0 : i32
    %c0_i32_1 = arith.constant 0 : i32
    return %c0_i32, %c0_i32_0 : i32, i32
  }
  func.func @transform_2(%arg0: i32) -> (i32, i32) {
    %c0_i32 = arith.constant 0 : i32
    %c0_i32_0 = arith.constant 0 : i32
    %c0_i32_1 = arith.constant 0 : i32
    return %c0_i32, %c0_i32_0 : i32, i32
  }
  func.func @transform_3(%arg0: i32) -> (i32, i32) {
    %c0_i32 = arith.constant 0 : i32
    %c0_i32_0 = arith.constant 0 : i32
    %c0_i32_1 = arith.constant 0 : i32
    return %c0_i32, %c0_i32_0 : i32, i32
  }
  func.func @transform_4(%arg0: i32) -> (i32, i32) {
    %c0_i32 = arith.constant 0 : i32
    %c0_i32_0 = arith.constant 0 : i32
    %c0_i32_1 = arith.constant 0 : i32
    return %c0_i32, %c0_i32_0 : i32, i32
  }
  func.func @transform_5(%arg0: i32) -> (i32, i32) {
    %c0_i32 = arith.constant 0 : i32
    %c0_i32_0 = arith.constant 0 : i32
    return %c0_i32, %arg0 : i32, i32
  }
  func.func @transform_6(%arg0: i32) -> (i32, i32) {
    %c0_i32 = arith.constant 0 : i32
    %c0_i32_0 = arith.constant 0 : i32
    return %c0_i32, %arg0 : i32, i32
  }
  func.func @transform_7(%arg0: i32) -> (i32, i32) {
    %c0_i32 = arith.constant 0 : i32
    %c0_i32_0 = arith.constant 0 : i32
    return %c0_i32, %arg0 : i32, i32
  }
}

</mosaic_0001>

<bundles_post_ra>
// kernel: rnn_gru_forward.1
= control target key start
LH: loop header
LB: loop body
LE: loop exit
PB: predicated region body
PF: predicated region fallthrough
CT: control target
= control target key end

     0   :  { %12 = vsyncpa [#allocation4], 0  ;;  %s3641_s0 = inlined_call_operand.vmem [shape: f32[8,128], index: 0, kind: input, shape index: {}]   ;;  %s3642_s1 = inlined_call_operand.hbm [shape: f32[128,384], index: 1, kind: input, shape index: {}]   ;;  %s3643_s2 = inlined_call_operand.vmem [shape: f32[1,384], index: 2, kind: input, shape index: {}]   ;;  %s3644_s3 = inlined_call_operand.hbm [shape: f32[128,384], index: 3, kind: input, shape index: {}]   ;;  %s3645_s4 = inlined_call_operand.vmem [shape: f32[1,384], index: 4, kind: input, shape index: {}]   ;;  %s3646_s5 = inlined_call_operand.vmem [shape: bf16[128,128], index: 5, kind: input, shape index: {}]   ;;  %s3647_s6 = inlined_call_operand.vmem [shape: f32[1,128], index: 6, kind: input, shape index: {}]   ;;  %s3648_s7 = inlined_call_operand.hbm [shape: f32[8,128], index: 7, kind: output, shape index: {}]  }
   0x1   :  { %13 = vsyncpa [#allocation7], 0 }
   0x2   :  { %14 = vsyncpa [#allocation5], 0  ;;  %s3075_s24 = smov [#allocation3]   ;;  %s3003_s28 = scalar_lea.hbm %s3642_s1, 6144 }
   0x3   :  { %s22_s25 = sshll.u32 %s3075_s24, 4  ;;  %p3004_p0 = scmp.ne.s32.totalorder %s3642_s1, %s3003_s28  ;;  %s23_s25 = int_to_ptr.vmem [resolvable:$true] %s22_s25 }
   0x4   :  { %p3007_p1 = scmp.lt.u32.totalorder %s3003_s28, %s3642_s1 }
   0x6   :  { %p3009_p2 = pnand %p3007_p1, %p3004_p0 }
   0x8   :  { %3012 = shalt.err (!%p3009_p2)
}
   0x9   :  { %s3013_s10 = scalar_lea.vmem %s23_s25, 6144  ;;  %p3018_p4 = scmp.lt.s32.totalorder %s23_s25, %s23_s25 }
   0xa   :  { %p3014_p3 = scmp.ne.s32.totalorder %s23_s25, %s3013_s10  ;;  %p3019_p5 = scmp.lt.s32.totalorder %s3013_s10, %s3013_s10 }
   0xc   :  { %p3020_p6 = por %p3019_p5, %p3018_p4 }
   0xe   :  { %p3021_p7 = pnand %p3020_p6, %p3014_p3 }
  0x10   :  { %3024 = shalt.err (!%p3021_p7)
}
  0x11   :  { %s3076_s11 = smov 384   ;;  %s3077_s12 = smov 24  }
  0x12   :  { %28 = dma.hbm_to_vmem [thread:$0]  %s3642_s1, 6144, %s23_s25, [#allocation4], %s3076_s11, %s3076_s11, %s3077_s12  }
  0x13   :  { %s3078_s15 = smov [#allocation6]   ;;  %s3025_s19 = scalar_lea.hbm %s3644_s3, 6144 }
  0x14   :  { %s36_s16 = sshll.u32 %s3078_s15, 4  ;;  %p3026_p8 = scmp.ne.s32.totalorder %s3644_s3, %s3025_s19  ;;  %s37_s16 = int_to_ptr.vmem [resolvable:$true] %s36_s16 }
  0x15   :  { %p3029_p9 = scmp.lt.u32.totalorder %s3025_s19, %s3644_s3 }
  0x17   :  { %p3031_p10 = pnand %p3029_p9, %p3026_p8 }
  0x19   :  { %3034 = shalt.err (!%p3031_p10)
}
  0x1a   :  { %s3035_s24 = scalar_lea.vmem %s37_s16, 6144  ;;  %p3040_p12 = scmp.lt.s32.totalorder %s37_s16, %s37_s16 }
  0x1b   :  { %p3036_p11 = scmp.ne.s32.totalorder %s37_s16, %s3035_s24  ;;  %p3041_p13 = scmp.lt.s32.totalorder %s3035_s24, %s3035_s24 }
  0x1d   :  { %p3042_p0 = por %p3041_p13, %p3040_p12 }
  0x1f   :  { %p3043_p1 = pnand %p3042_p0, %p3036_p11 }
  0x21   :  { %3046 = shalt.err (!%p3043_p1)
}
  0x22   :  { %42 = dma.hbm_to_vmem [thread:$0]  %s3644_s3, 6144, %s37_s16, [#allocation7], %s3076_s11, %s3076_s11, %s3077_s12  }
  0x23   :  { %3069 = dma.done.wait [#allocation4], 6144  }
  0x24   :  { %3070 = vsyncadd [#allocation4], 4294961152 }
  0x25   :  { %3071 = dma.done.wait [#allocation7], 6144  }
  0x26   :  { %3072 = vsyncadd [#allocation7], 4294961152  ;;  %v3079_v0 = vmov 0.0   ;;  %v62_v1 = vld [vmem:[#allocation3 + $0x8] sm:$0xff]  ;;  %v65_v2 = vld [vmem:[#allocation3 + $0x20] sm:$0xff]  ;;  %vm3081_vm0 = vmmov 0  }
  0x27   :  { %190 = vmatprep.mubr.f32.mxu1 %v3079_v0  ;;  %396 = vmatprep.mubr.f32.mxu0 %v3079_v0  ;;  %v268_v3 = vld [vmem:[#allocation6 + $0x8] sm:$0xff]  ;;  %v2403_v4 = vpack.c.bf16 %v65_v2, %v62_v1  ;;  %v271_v5 = vld [vmem:[#allocation6 + $0x20] sm:$0xff]  ;;  %v64_v7 = vld [vmem:[#allocation3 + $0x18] sm:$0xff]  ;;  %s3082_s22 = smov [#allocation8]  }
  0x28   :  { %v61_v6 = vld [vmem:[#allocation3] sm:$0xff]  ;;  %v3149_v8 = vpack.c.bf16 %v271_v5, %v268_v3  ;;  %v270_v11 = vld [vmem:[#allocation6 + $0x18] sm:$0xff]  ;;  %v71_v14 = vld [vmem:[#allocation3 + $0x50] sm:$0xff]  ;;  %s1871_s23 = sshll.u32 %s3082_s22, 4  ;;  %s1872_s23 = int_to_ptr.vmem [resolvable:$true] %s1871_s23 }
  0x29   :  { %v2405_v9 = vpack.c.bf16 %v64_v7, %v61_v6  ;;  %v267_v10 = vld [vmem:[#allocation6] sm:$0xff]  ;;  %v68_v12 = vld [vmem:[#allocation3 + $0x38] sm:$0xff]  ;;  %2404 = vmatprep.subr.bf16.mxu1 %v2403_v4  ;;  %v277_v16 = vld [vmem:[#allocation6 + $0x50] sm:$0xff]  ;;  %s3047_s24 = scalar_lea.vmem %s1872_s23, 128  ;;  %p3052_p3 = scmp.lt.s32.totalorder %s1872_s23, %s1872_s23 }
  0x2a   :  { %v3151_v13 = vpack.c.bf16 %v270_v11, %v267_v10  ;;  %v274_v15 = vld [vmem:[#allocation6 + $0x38] sm:$0xff]  ;;  %2460 = vmatprep.subr.bf16.mxu0 %v3149_v8  ;;  %v2407_v17 = vpack.c.bf16 %v71_v14, %v68_v12  ;;  %v67_v19 = vld [vmem:[#allocation3 + $0x30] sm:$0xff]  ;;  %v70_v20 = vld [vmem:[#allocation3 + $0x48] sm:$0xff]  ;;  %p3048_p2 = scmp.ne.s32.totalorder %s1872_s23, %s3047_s24  ;;  %p3053_p4 = scmp.lt.s32.totalorder %s3047_s24, %s3047_s24 }
  0x2b   :  { %2406 = vmatpush1.bf16.msra.mxu1 %v2405_v9  ;;  %v3154_v18 = vpack.c.bf16 %v277_v16, %v274_v15  ;;  %v273_v21 = vld [vmem:[#allocation6 + $0x30] sm:$0xff]  ;;  %v2409_v22 = vpack.c.bf16 %v70_v20, %v67_v19  ;;  %v276_v23 = vld [vmem:[#allocation6 + $0x48] sm:$0xff]  ;;  %v77_v25 = vld [vmem:[#allocation3 + $0x80] sm:$0xff] }
  0x2c   :  { %2462 = vmatpush1.bf16.msra.mxu0 %v3151_v13  ;;  %v74_v24 = vld [vmem:[#allocation3 + $0x68] sm:$0xff]  ;;  %2408 = vmatprep.subr.bf16.mxu1 %v2407_v17  ;;  %v3158_v26 = vpack.c.bf16 %v276_v23, %v273_v21  ;;  %v283_v29 = vld [vmem:[#allocation6 + $0x80] sm:$0xff]  ;;  %v76_v32 = vld [vmem:[#allocation3 + $0x78] sm:$0xff]  ;;  %p3054_p5 = por %p3053_p4, %p3052_p3 }
  0x2d   :  { %2464 = vmatprep.subr.bf16.mxu0 %v3154_v18  ;;  %v2411_v27 = vpack.c.bf16 %v77_v25, %v74_v24  ;;  %v280_v28 = vld [vmem:[#allocation6 + $0x68] sm:$0xff]  ;;  %v73_v30 = vld [vmem:[#allocation3 + $0x60] sm:$0xff]  ;;  %v282_v34 = vld [vmem:[#allocation6 + $0x78] sm:$0xff] }
  0x2e   :  { %v3160_v31 = vpack.c.bf16 %v283_v29, %v280_v28  ;;  %v279_v33 = vld [vmem:[#allocation6 + $0x60] sm:$0xff]  ;;  %v2413_v35 = vpack.c.bf16 %v76_v32, %v73_v30  ;;  %v80_v36 = vld [vmem:[#allocation3 + $0x98] sm:$0xff]  ;;  %v83_v37 = vld [vmem:[#allocation3 + $0xb0] sm:$0xff]  ;;  %p3055_p6 = pnand %p3054_p5, %p3048_p2 }
  0x2f   :  { %2410 = vmatpush1.bf16.msra.mxu1 %v2409_v22  ;;  %v286_v38 = vld [vmem:[#allocation6 + $0x98] sm:$0xff]  ;;  %v3163_v39 = vpack.c.bf16 %v282_v34, %v279_v33  ;;  %v2415_v40 = vpack.c.bf16 %v83_v37, %v80_v36  ;;  %v289_v41 = vld [vmem:[#allocation6 + $0xb0] sm:$0xff]  ;;  %v82_v43 = vld [vmem:[#allocation3 + $0xa8] sm:$0xff] }
  0x30   :  { %2466 = vmatpush1.bf16.msra.mxu0 %v3158_v26  ;;  %2412 = vmatprep.subr.bf16.mxu1 %v2411_v27  ;;  %v79_v42 = vld [vmem:[#allocation3 + $0x90] sm:$0xff]  ;;  %v3166_v44 = vpack.c.bf16 %v289_v41, %v286_v38  ;;  %v288_v46 = vld [vmem:[#allocation6 + $0xa8] sm:$0xff]  ;;  %v89_v48 = vld [vmem:[#allocation3 + $0xe0] sm:$0xff] }
  0x31   :  { %2468 = vmatprep.subr.bf16.mxu0 %v3160_v31  ;;  %v285_v45 = vld [vmem:[#allocation6 + $0x90] sm:$0xff]  ;;  %v86_v47 = vld [vmem:[#allocation3 + $0xc8] sm:$0xff]  ;;  %v295_v50 = vld [vmem:[#allocation6 + $0xe0] sm:$0xff]  ;;  %v2417_v51 = vpack.c.bf16 %v82_v43, %v79_v42 }
  0x32   :  { %v292_v49 = vld [vmem:[#allocation6 + $0xc8] sm:$0xff]  ;;  %v3169_v52 = vpack.c.bf16 %v288_v46, %v285_v45  ;;  %v2419_v53 = vpack.c.bf16 %v89_v48, %v86_v47  ;;  %v85_v54 = vld [vmem:[#allocation3 + $0xc0] sm:$0xff]  ;;  %v88_v55 = vld [vmem:[#allocation3 + $0xd8] sm:$0xff]  ;;  %v3080_v47 = vmov 0.0|0.0  }
  0x33   :  { %2414 = vmatpush1.bf16.msra.mxu1 %v2413_v35  ;;  %v291_v56 = vld [vmem:[#allocation6 + $0xc0] sm:$0xff]  ;;  %v3172_v57 = vpack.c.bf16 %v295_v50, %v292_v49  ;;  %v294_v58 = vld [vmem:[#allocation6 + $0xd8] sm:$0xff]  ;;  %v95_v60 = vld [vmem:[#allocation3 + $0x110] sm:$0xff]  ;;  %v2421_v63 = vpack.c.bf16 %v88_v55, %v85_v54 }
  0x34   :  { %2470 = vmatpush1.bf16.msra.mxu0 %v3163_v39  ;;  %2416 = vmatprep.subr.bf16.mxu1 %v2415_v40  ;;  %v92_v59 = vld [vmem:[#allocation3 + $0xf8] sm:$0xff]  ;;  %v301_v62 = vld [vmem:[#allocation6 + $0x110] sm:$0xff]  ;;  %v3175_v1 = vpack.c.bf16 %v294_v58, %v291_v56  ;;  %v94_v4 = vld [vmem:[#allocation3 + $0x108] sm:$0xff] }
  0x35   :  { %2472 = vmatprep.subr.bf16.mxu0 %v3166_v44  ;;  %v298_v61 = vld [vmem:[#allocation6 + $0xf8] sm:$0xff]  ;;  %v2423_v2 = vpack.c.bf16 %v95_v60, %v92_v59  ;;  %v91_v3 = vld [vmem:[#allocation3 + $0xf0] sm:$0xff]  ;;  %v300_v7 = vld [vmem:[#allocation6 + $0x108] sm:$0xff] }
  0x36   :  { %v297_v5 = vld [vmem:[#allocation6 + $0xf0] sm:$0xff]  ;;  %v3178_v6 = vpack.c.bf16 %v301_v62, %v298_v61  ;;  %v98_v9 = vld [vmem:[#allocation3 + $0x128] sm:$0xff]  ;;  %v101_v10 = vld [vmem:[#allocation3 + $0x140] sm:$0xff]  ;;  %v2425_v14 = vpack.c.bf16 %v94_v4, %v91_v3 }
  0x37   :  { %2418 = vmatpush1.bf16.msra.mxu1 %v2417_v51  ;;  %v304_v11 = vld [vmem:[#allocation6 + $0x128] sm:$0xff]  ;;  %v307_v12 = vld [vmem:[#allocation6 + $0x140] sm:$0xff]  ;;  %v3181_v15 = vpack.c.bf16 %v300_v7, %v297_v5  ;;  %v2427_v16 = vpack.c.bf16 %v101_v10, %v98_v9  ;;  %v100_v19 = vld [vmem:[#allocation3 + $0x138] sm:$0xff] }
  0x38   :  { %2474 = vmatpush1.bf16.msra.mxu0 %v3169_v52  ;;  %2420 = vmatprep.subr.bf16.mxu1 %v2419_v53  ;;  %v97_v17 = vld [vmem:[#allocation3 + $0x120] sm:$0xff]  ;;  %v3184_v21 = vpack.c.bf16 %v307_v12, %v304_v11  ;;  %v306_v22 = vld [vmem:[#allocation6 + $0x138] sm:$0xff]  ;;  %v107_v24 = vld [vmem:[#allocation3 + $0x170] sm:$0xff] }
  0x39   :  { %2476 = vmatprep.subr.bf16.mxu0 %v3172_v57  ;;  %v303_v20 = vld [vmem:[#allocation6 + $0x120] sm:$0xff]  ;;  %v104_v23 = vld [vmem:[#allocation3 + $0x158] sm:$0xff]  ;;  %v313_v27 = vld [vmem:[#allocation6 + $0x170] sm:$0xff]  ;;  %v2429_v28 = vpack.c.bf16 %v100_v19, %v97_v17 }
  0x3a   :  { %v310_v25 = vld [vmem:[#allocation6 + $0x158] sm:$0xff]  ;;  %v3187_v29 = vpack.c.bf16 %v306_v22, %v303_v20  ;;  %v2431_v30 = vpack.c.bf16 %v107_v24, %v104_v23  ;;  %v103_v32 = vld [vmem:[#allocation3 + $0x150] sm:$0xff]  ;;  %v106_v33 = vld [vmem:[#allocation3 + $0x168] sm:$0xff] }
  0x3b   :  { %2422 = vmatpush1.bf16.msra.mxu1 %v2421_v63  ;;  %v3190_v34 = vpack.c.bf16 %v313_v27, %v310_v25  ;;  %v309_v35 = vld [vmem:[#allocation6 + $0x150] sm:$0xff]  ;;  %v312_v36 = vld [vmem:[#allocation6 + $0x168] sm:$0xff]  ;;  %v2433_v37 = vpack.c.bf16 %v106_v33, %v103_v32  ;;  %v3199_v42 = vld [vmem:[%s3641_s0] sm:$0xff] }
  0x3c   :  { %2478 = vmatpush1.bf16.msra.mxu0 %v3175_v1  ;;  %2424 = vmatprep.subr.bf16.mxu1 %v2423_v2  ;;  %v3193_v38 = vpack.c.bf16 %v312_v36, %v309_v35  ;;  %v63_v40 = vld [vmem:[#allocation3 + $0x10] sm:$0xff]  ;;  %v66_v41 = vld [vmem:[#allocation3 + $0x28] sm:$0xff]  ;;  %v69_v45 = vld [vmem:[#allocation3 + $0x40] sm:$0xff] }
  0x3d   :  { %2480 = vmatprep.subr.bf16.mxu0 %v3178_v6  ;;  %v2436_v43 = vpack.c.bf16 %v66_v41, %v63_v40  ;;  %v72_v46 = vld [vmem:[#allocation3 + $0x58] sm:$0xff]  ;;  %v75_v48 = vld [vmem:[#allocation3 + $0x70] sm:$0xff]  ;;  %v78_v49 = vld [vmem:[#allocation3 + $0x88] sm:$0xff] }
  0x3e   :  { %v2439_v50 = vpack.c.bf16 %v72_v46, %v69_v45  ;;  %v2442_v51 = vpack.c.bf16 %v78_v49, %v75_v48  ;;  %v81_v53 = vld [vmem:[#allocation3 + $0xa0] sm:$0xff]  ;;  %v84_v54 = vld [vmem:[#allocation3 + $0xb8] sm:$0xff]  ;;  %v87_v56 = vld [vmem:[#allocation3 + $0xd0] sm:$0xff]  ;;  %v111_v49 = vlaneseq }
  0x3f   :  { %2426 = vmatpush1.bf16.msra.mxu1 %v2425_v14  ;;  %v2445_v55 = vpack.c.bf16 %v84_v54, %v81_v53  ;;  %v90_v58 = vld [vmem:[#allocation3 + $0xe8] sm:$0xff]  ;;  %v93_v60 = vld [vmem:[#allocation3 + $0x100] sm:$0xff]  ;;  %v96_v61 = vld [vmem:[#allocation3 + $0x118] sm:$0xff] }
  0x40   :  { %2482 = vmatpush1.bf16.msra.mxu0 %v3181_v15  ;;  %2428 = vmatprep.subr.bf16.mxu1 %v2427_v16  ;;  %v2448_v59 = vpack.c.bf16 %v90_v58, %v87_v56  ;;  %v2451_v62 = vpack.c.bf16 %v96_v61, %v93_v60  ;;  %v99_v63 = vld [vmem:[#allocation3 + $0x130] sm:$0xff]  ;;  %v102_v2 = vld [vmem:[#allocation3 + $0x148] sm:$0xff]  ;;  %v105_v4 = vld [vmem:[#allocation3 + $0x160] sm:$0xff] }
  0x41   :  { %2484 = vmatprep.subr.bf16.mxu0 %v3184_v21  ;;  %v2454_v3 = vpack.c.bf16 %v102_v2, %v99_v63  ;;  %v108_v5 = vld [vmem:[#allocation3 + $0x178] sm:$0xff]  ;;  %v269_v9 = vld [vmem:[#allocation6 + $0x10] sm:$0xff]  ;;  %v272_v10 = vld [vmem:[#allocation6 + $0x28] sm:$0xff] }
  0x42   :  { %v2457_v7 = vpack.c.bf16 %v108_v5, %v105_v4  ;;  %v3230_v11 = vpack.c.bf16 %v272_v10, %v269_v9  ;;  %v275_v12 = vld [vmem:[#allocation6 + $0x40] sm:$0xff]  ;;  %v278_v14 = vld [vmem:[#allocation6 + $0x58] sm:$0xff]  ;;  %v281_v17 = vld [vmem:[#allocation6 + $0x70] sm:$0xff] }
  0x43   :  { %2430 = vmatpush1.bf16.msra.mxu1 %v2429_v28  ;;  %v3237_v16 = vpack.c.bf16 %v278_v14, %v275_v12  ;;  %v284_v19 = vld [vmem:[#allocation6 + $0x88] sm:$0xff]  ;;  %v287_v22 = vld [vmem:[#allocation6 + $0xa0] sm:$0xff]  ;;  %v290_v23 = vld [vmem:[#allocation6 + $0xb8] sm:$0xff] }
  0x44   :  { %2486 = vmatpush1.bf16.msra.mxu0 %v3187_v29  ;;  %2432 = vmatprep.subr.bf16.mxu1 %v2431_v30  ;;  %v3243_v20 = vpack.c.bf16 %v284_v19, %v281_v17  ;;  %v3247_v24 = vpack.c.bf16 %v290_v23, %v287_v22  ;;  %v293_v25 = vld [vmem:[#allocation6 + $0xd0] sm:$0xff]  ;;  %v296_v27 = vld [vmem:[#allocation6 + $0xe8] sm:$0xff]  ;;  %v299_v30 = vld [vmem:[#allocation6 + $0x100] sm:$0xff] }
  0x45   :  { %2488 = vmatprep.subr.bf16.mxu0 %v3190_v34  ;;  %v3251_v28 = vpack.c.bf16 %v296_v27, %v293_v25  ;;  %v302_v32 = vld [vmem:[#allocation6 + $0x118] sm:$0xff]  ;;  %v305_v35 = vld [vmem:[#allocation6 + $0x130] sm:$0xff]  ;;  %v308_v36 = vld [vmem:[#allocation6 + $0x148] sm:$0xff] }
  0x46   :  { %v3255_v33 = vpack.c.bf16 %v302_v32, %v299_v30  ;;  %v311_v40 = vld [vmem:[#allocation6 + $0x160] sm:$0xff]  ;;  %v314_v41 = vld [vmem:[#allocation6 + $0x178] sm:$0xff] }
  0x47   :  { %2434 = vmatpush1.bf16.msra.mxu1 %v2433_v37  ;;  %v3259_v37 = vpack.c.bf16 %v308_v36, %v305_v35  ;;  %v109_v53 = vld [vmem:[%s3643_s2] sm:$0x7] }
  0x48   :  { %2490 = vmatpush1.bf16.msra.mxu0 %v3193_v38  ;;  %2435 = vmatprep.subr.bf16.mxu1 %v3080_v47  ;;  %v315_v54 = vld [vmem:[%s3645_s4] sm:$0x7] }
  0x49   :  { %2516 = vmatprep.subr.bf16.mxu0 %v3149_v8 }
  0x4a   :  { %191 = vmatmul.mubr.f32.vlgmr.msra.gmra.mrb[0].mxu1 %v3199_v42 }
  0x4b   :  { %397 = vmatmul.mubr.f32.vlgmr.msra.gmra.mrb[0].mxu0 %v3079_v0  ;;  %2437 = vmatpush3.bf16.msra.mxu1 %v2436_v43 }
  0x4c   :  { %2438 = vmatprep.subr.bf16.mxu1 %v3080_v47  ;;  %2100 = vmatprep.mubr.msk.f32.mxu1 %vm3081_vm0, %v3079_v0 }
  0x4d   :  { %2518 = vmatpush1.bf16.msra.mxu0 %v3151_v13  ;;  %558 = vmatprep.mubr.f32.mxu0 %v3079_v0 }
  0x4e   :  { %2520 = vmatprep.subr.bf16.mxu0 %v3154_v18 }
  0x4f   :  { %2440 = vmatpush3.bf16.msra.mxu1 %v2439_v50  ;;  %v112_v50 = vshrl.u32 %v111_v49, 7 }
  0x50   :  { %2441 = vmatprep.subr.bf16.mxu1 %v3080_v47 }
  0x51   :  { %2522 = vmatpush1.bf16.msra.mxu0 %v3158_v26  ;;  %v117_v2 = vsub.s32 1, %v112_v50  ;;  %v121_v17 = vsub.s32 2, %v112_v50 }
  0x52   :  { %2524 = vmatprep.subr.bf16.mxu0 %v3160_v31 }
  0x53   :  { %2443 = vmatpush3.bf16.msra.mxu1 %v2442_v51  ;;  %v113_v51 = vsub.s32 0, %v112_v50  ;;  %v3299_v4 = vrot.slane %v315_v54, %v117_v2  ;;  %v3305_v19 = vrot.slane %v315_v54, %v121_v17  ;;  %v122_v22 = vrot.slane %v109_v53, %v121_v17 }
  0x54   :  { %2444 = vmatprep.subr.bf16.mxu1 %v3080_v47 }
  0x55   :  { %2526 = vmatpush1.bf16.msra.mxu0 %v3163_v39  ;;  %v3293_v56 = vrot.slane %v315_v54, %v113_v51 }
  0x56   :  { %2528 = vmatprep.subr.bf16.mxu0 %v3166_v44 }
  0x57   :  { %2446 = vmatpush3.bf16.msra.mxu1 %v2445_v55  ;;  %v114_v55 = vrot.slane %v109_v53, %v113_v51 }
  0x58   :  { %2447 = vmatprep.subr.bf16.mxu1 %v3080_v47 }
  0x59   :  { %2530 = vmatpush1.bf16.msra.mxu0 %v3169_v52 }
  0x5a   :  { %2532 = vmatprep.subr.bf16.mxu0 %v3172_v57 }
  0x5b   :  { %2449 = vmatpush3.bf16.msra.mxu1 %v2448_v59 }
  0x5c   :  { %2450 = vmatprep.subr.bf16.mxu1 %v3080_v47 }
  0x5d   :  { %2534 = vmatpush1.bf16.msra.mxu0 %v3175_v1 }
  0x5e   :  { %2536 = vmatprep.subr.bf16.mxu0 %v3178_v6 }
  0x5f   :  { %2452 = vmatpush3.bf16.msra.mxu1 %v2451_v62 }
  0x60   :  { %2453 = vmatprep.subr.bf16.mxu1 %v3080_v47 }
  0x61   :  { %2538 = vmatpush1.bf16.msra.mxu0 %v3181_v15 }
  0x62   :  { %2540 = vmatprep.subr.bf16.mxu0 %v3184_v21 }
  0x63   :  { %2455 = vmatpush3.bf16.msra.mxu1 %v2454_v3  ;;  %v118_v3 = vrot.slane %v109_v53, %v117_v2 }
  0x64   :  { %2456 = vmatprep.subr.bf16.mxu1 %v3080_v47 }
  0x65   :  { %2542 = vmatpush1.bf16.msra.mxu0 %v3187_v29 }
  0x66   :  { %2544 = vmatprep.subr.bf16.mxu0 %v3190_v34 }
  0x67   :  { %2458 = vmatpush3.bf16.msra.mxu1 %v2457_v7 }
  0x68   :  { %2491 = vmatprep.subr.bf16.mxu1 %v3080_v47 }
  0x69   :  { %2546 = vmatpush1.bf16.msra.mxu0 %v3193_v38 }
  0x6a   :  { %2101 = vmatmul.mubr.f32.vlgmr.msra.gmra.mrb[2].mxu1 %v3199_v42  ;;  %2572 = vmatprep.subr.bf16.mxu0 %v3149_v8  ;;  %v3263_v42 = vpack.c.bf16 %v314_v41, %v311_v40 }
  0x6b   :  { %2493 = vmatpush3.bf16.msra.mxu1 %v3230_v11  ;;  %2135 = vmatprep.mubr.msk.f32.mxu1 %vm3081_vm0, %v3079_v0 }
  0x6c   :  { %2494 = vmatprep.subr.bf16.mxu1 %v3080_v47 }
  0x6f   :  { %2496 = vmatpush3.bf16.msra.mxu1 %v3237_v16 }
  0x70   :  { %2497 = vmatprep.subr.bf16.mxu1 %v3080_v47 }
  0x73   :  { %2499 = vmatpush3.bf16.msra.mxu1 %v3243_v20 }
  0x74   :  { %2500 = vmatprep.subr.bf16.mxu1 %v3080_v47 }
  0x77   :  { %2502 = vmatpush3.bf16.msra.mxu1 %v3247_v24 }
  0x78   :  { %2503 = vmatprep.subr.bf16.mxu1 %v3080_v47 }
  0x7b   :  { %2505 = vmatpush3.bf16.msra.mxu1 %v3251_v28 }
  0x7c   :  { %2506 = vmatprep.subr.bf16.mxu1 %v3080_v47 }
  0x7f   :  { %2508 = vmatpush3.bf16.msra.mxu1 %v3255_v33 }
  0x80   :  { %2509 = vmatprep.subr.bf16.mxu1 %v3080_v47 }
  0x83   :  { %2511 = vmatpush3.bf16.msra.mxu1 %v3259_v37 }
  0x84   :  { %2512 = vmatprep.subr.bf16.mxu1 %v3080_v47 }
  0x87   :  { %2514 = vmatpush3.bf16.msra.mxu1 %v3263_v42 }
  0x88   :  { %2547 = vmatprep.subr.bf16.mxu1 %v3080_v47 }
  0x8a   :  { %2136 = vmatmul.mubr.f32.vlgmr.msra.gmra.mrb[4].mxu1 %v3079_v0 }
  0x8b   :  { %2549 = vmatpush3.bf16.msra.mxu1 %v3230_v11  ;;  %2170 = vmatprep.mubr.msk.f32.mxu1 %vm3081_vm0, %v3079_v0 }
  0x8c   :  { %2550 = vmatprep.subr.bf16.mxu1 %v3080_v47 }
  0x8f   :  { %2552 = vmatpush3.bf16.msra.mxu1 %v3237_v16 }
  0x90   :  { %2553 = vmatprep.subr.bf16.mxu1 %v3080_v47 }
  0x93   :  { %2555 = vmatpush3.bf16.msra.mxu1 %v3243_v20 }
  0x94   :  { %2556 = vmatprep.subr.bf16.mxu1 %v3080_v47 }
  0x97   :  { %2558 = vmatpush3.bf16.msra.mxu1 %v3247_v24 }
  0x98   :  { %2559 = vmatprep.subr.bf16.mxu1 %v3080_v47 }
  0x9b   :  { %2561 = vmatpush3.bf16.msra.mxu1 %v3251_v28 }
  0x9c   :  { %2562 = vmatprep.subr.bf16.mxu1 %v3080_v47 }
  0x9f   :  { %2564 = vmatpush3.bf16.msra.mxu1 %v3255_v33 }
  0xa0   :  { %2565 = vmatprep.subr.bf16.mxu1 %v3080_v47 }
  0xa3   :  { %2567 = vmatpush3.bf16.msra.mxu1 %v3259_v37 }
  0xa4   :  { %2568 = vmatprep.subr.bf16.mxu1 %v3080_v47 }
  0xa7   :  { %2570 = vmatpush3.bf16.msra.mxu1 %v3263_v42 }
  0xa8   :  { %2603 = vmatprep.subr.bf16.mxu1 %v3080_v47 }
 0x11d   :  { %v192_v43 = vpop.f32.mrb[0].mxu1 }
 0x11e   :  { %v398_v45 = vpop.f32.mrb[0].mxu0  ;;  %v194_v46 = vpop.f32.mrb[1].mxu1  ;;  %v3295_v58 = vadd.f32 %v192_v43, %v114_v55 }
 0x11f   :  { %v400_v48 = vpop.f32.mrb[1].mxu0  ;;  %v399_v59 = vadd.f32 %v398_v45, %v3293_v56  ;;  %v3301_v5 = vadd.f32 %v194_v46, %v118_v3 }
 0x120   :  { %v401_v7 = vadd.f32 %v400_v48, %v3299_v4 }
 0x121   :  { %v473_v60 = vadd.f32 %v399_v59, %v3295_v58 }
 0x122   :  { %v474_v9 = vadd.f32 %v401_v7, %v3301_v5 }
 0x123   :  { %v1881_v63 = vmul.f32 -1.442695, %v473_v60 }
 0x124   :  { %v1882_v12 = vmul.f32 -1.442695, %v474_v9 }
 0x125   :  { %2923 = vpow2.f32 %v1881_v63 }
 0x126   :  { %2925 = vpow2.f32 %v1882_v12 }
 0x12f   :  { %v2924_v10 = vpop.eup %2923 }
 0x130   :  { %v478_v14 = vadd.f32 1.0, %v2924_v10  ;;  %v2926_v25 = vpop.eup %2925 }
 0x131   :  { %v484_v40 = vadd.f32 1.0, %v2926_v25 }
 0x132   :  { %2927 = vrcp.f32 %v478_v14 }
 0x13c   :  { %v2928_v32 = vpop.eup %2927 }
 0x13d   :  { %v263_v61 = vpop.f32.mrb[2].mxu1 }
 0x13e   :  { %v2102_v62 = vpop.f32.mrb[3].mxu1  ;;  %v3308_v35 = vadd.f32 %v263_v61, %v122_v22 }
 0x15d   :  { %v469_v23 = vpop.f32.mrb[4].mxu1 }
 0x15e   :  { %v470_v27 = vadd.f32 %v469_v23, %v3305_v19  ;;  %v2137_v30 = vpop.f32.mrb[5].mxu1 }
 0x160   :  { %v487_v36 = vmul.f32 %v2928_v32, %v470_v27 }
 0x162   :  { %v488_v41 = vadd.f32 %v487_v36, %v3308_v35 }
 0x164   :  { %2929 = vtanh.f32 %v488_v41 }
 0x165   :  { %2931 = vrcp.f32 %v484_v40 }
 0x16e   :  { %v2930_v43 = vpop.eup %2929 }
 0x16f   :  { %v490_v45 = vsub.f32 0.0, %v2930_v43  ;;  %v2932_v46 = vpop.eup %2931 }
 0x171   :  { %v491_v48 = vmul.f32 %v2932_v46, %v490_v45 }
 0x173   :  { %v3311_v49 = vadd.f32 %v2930_v43, %v491_v48 }
 0x175   :  { %493 = vst [vmem:[#allocation2] sm:$0x1] %v3311_v49  ;;  %559 = vmatmul.mubr.f32.vlgmr.msra.gmra.mrb[2].mxu0 %v3311_v49  ;;  %2171 = vmatmul.mubr.f32.vlgmr.msra.gmra.mrb[6].mxu1 %v3311_v49 }
 0x176   :  { %2574 = vmatpush1.bf16.msra.mxu0 %v3151_v13  ;;  %2605 = vmatpush3.bf16.msra.mxu1 %v3230_v11 }
 0x177   :  { %2576 = vmatprep.subr.bf16.mxu0 %v3154_v18  ;;  %2606 = vmatprep.subr.bf16.mxu1 %v3080_v47 }
 0x178   :  { %738 = vmatprep.mubr.f32.mxu0 %v3079_v0  ;;  %2205 = vmatprep.mubr.msk.f32.mxu1 %vm3081_vm0, %v3079_v0 }
 0x17a   :  { %2578 = vmatpush1.bf16.msra.mxu0 %v3158_v26  ;;  %2608 = vmatpush3.bf16.msra.mxu1 %v3237_v16 }
 0x17b   :  { %2580 = vmatprep.subr.bf16.mxu0 %v3160_v31  ;;  %2609 = vmatprep.subr.bf16.mxu1 %v3080_v47 }
 0x17e   :  { %2582 = vmatpush1.bf16.msra.mxu0 %v3163_v39  ;;  %2611 = vmatpush3.bf16.msra.mxu1 %v3243_v20 }
 0x17f   :  { %2584 = vmatprep.subr.bf16.mxu0 %v3166_v44  ;;  %2612 = vmatprep.subr.bf16.mxu1 %v3080_v47 }
 0x182   :  { %2586 = vmatpush1.bf16.msra.mxu0 %v3169_v52  ;;  %2614 = vmatpush3.bf16.msra.mxu1 %v3247_v24 }
 0x183   :  { %2588 = vmatprep.subr.bf16.mxu0 %v3172_v57  ;;  %2615 = vmatprep.subr.bf16.mxu1 %v3080_v47 }
 0x186   :  { %2590 = vmatpush1.bf16.msra.mxu0 %v3175_v1  ;;  %2617 = vmatpush3.bf16.msra.mxu1 %v3251_v28 }
 0x187   :  { %2592 = vmatprep.subr.bf16.mxu0 %v3178_v6  ;;  %2618 = vmatprep.subr.bf16.mxu1 %v3080_v47 }
 0x18a   :  { %2594 = vmatpush1.bf16.msra.mxu0 %v3181_v15  ;;  %2620 = vmatpush3.bf16.msra.mxu1 %v3255_v33 }
 0x18b   :  { %2596 = vmatprep.subr.bf16.mxu0 %v3184_v21  ;;  %2621 = vmatprep.subr.bf16.mxu1 %v3080_v47 }
 0x18e   :  { %2598 = vmatpush1.bf16.msra.mxu0 %v3187_v29  ;;  %2623 = vmatpush3.bf16.msra.mxu1 %v3259_v37 }
 0x18f   :  { %2600 = vmatprep.subr.bf16.mxu0 %v3190_v34  ;;  %2624 = vmatprep.subr.bf16.mxu1 %v3080_v47 }
 0x192   :  { %2602 = vmatpush1.bf16.msra.mxu0 %v3193_v38  ;;  %2626 = vmatpush3.bf16.msra.mxu1 %v3263_v42 }
 0x193   :  { %2628 = vmatprep.subr.bf16.mxu0 %v3149_v8  ;;  %2659 = vmatprep.subr.bf16.mxu1 %v3080_v47 }
 0x248   :  { %v560_v50 = vpop.f32.mrb[2].mxu0  ;;  %v631_v51 = vpop.f32.mrb[6].mxu1 }
 0x249   :  { %v561_v53 = vadd.f32 %v560_v50, %v3293_v56  ;;  %v562_v54 = vpop.f32.mrb[3].mxu0  ;;  %v2172_v55 = vpop.f32.mrb[7].mxu1  ;;  %v632_v10 = vadd.f32 %v631_v51, %v3305_v19 }
 0x24a   :  { %v563_v62 = vadd.f32 %v562_v54, %v3299_v4 }
 0x24b   :  { %v637_v59 = vrot.slane %v561_v53, 7  ;;  %v656_v12 = vrot.slane %v632_v10, 7 }
 0x24c   :  { %v638_v63 = vrot.slane %v563_v62, 7 }
 0x24d   :  { %v641_v60 = vadd.f32 %v637_v59, %v3295_v58 }
 0x24e   :  { %v642_v2 = vadd.f32 %v638_v63, %v3301_v5 }
 0x24f   :  { %v1883_v61 = vmul.f32 -1.442695, %v641_v60 }
 0x250   :  { %v1884_v9 = vmul.f32 -1.442695, %v642_v2 }
 0x251   :  { %2933 = vpow2.f32 %v1883_v61 }
 0x25b   :  { %v2934_v3 = vpop.eup %2933 }
 0x25c   :  { %v646_v7 = vadd.f32 1.0, %v2934_v3 }
 0x25e   :  { %2935 = vrcp.f32 %v646_v7 }
 0x25f   :  { %2937 = vpow2.f32 %v1884_v9 }
 0x268   :  { %v2936_v14 = vpop.eup %2935 }
 0x269   :  { %v658_v17 = vmul.f32 %v2936_v14, %v656_v12  ;;  %v2938_v23 = vpop.eup %2937 }
 0x26a   :  { %v652_v25 = vadd.f32 1.0, %v2938_v23 }
 0x26b   :  { %v659_v22 = vadd.f32 %v658_v17, %v3308_v35 }
 0x26d   :  { %2939 = vtanh.f32 %v659_v22 }
 0x26e   :  { %2941 = vrcp.f32 %v652_v25 }
 0x277   :  { %v2940_v27 = vpop.eup %2939 }
 0x278   :  { %v662_v30 = vrot.slane %v2940_v27, 1  ;;  %v2942_v40 = vpop.eup %2941 }
 0x27a   :  { %v664_v32 = vsub.f32 %v3311_v49, %v662_v30 }
 0x27c   :  { %v666_v36 = vrot.slane %v664_v32, 7 }
 0x27e   :  { %v668_v41 = vmul.f32 %v2942_v40, %v666_v36 }
 0x280   :  { %v3358_v43 = vadd.f32 %v2940_v27, %v668_v41 }
 0x282   :  { %670 = vst [vmem:[#allocation2] sm:$0x2] %v3358_v43  ;;  %v672_v45 = vrot.slane %v3358_v43, 1 }
 0x284   :  { %739 = vmatmul.mubr.f32.vlgmr.msra.gmra.mrb[4].mxu0 %v672_v45  ;;  %2206 = vmatmul.mubr.f32.vlgmr.msra.gmra.mrb[8].mxu1 %v672_v45 }
 0x285   :  { %2630 = vmatpush1.bf16.msra.mxu0 %v3151_v13  ;;  %2661 = vmatpush3.bf16.msra.mxu1 %v3230_v11 }
 0x286   :  { %2632 = vmatprep.subr.bf16.mxu0 %v3154_v18  ;;  %2662 = vmatprep.subr.bf16.mxu1 %v3080_v47 }
 0x287   :  { %918 = vmatprep.mubr.f32.mxu0 %v3079_v0  ;;  %2240 = vmatprep.mubr.msk.f32.mxu1 %vm3081_vm0, %v3079_v0 }
 0x289   :  { %2634 = vmatpush1.bf16.msra.mxu0 %v3158_v26  ;;  %2664 = vmatpush3.bf16.msra.mxu1 %v3237_v16 }
 0x28a   :  { %2636 = vmatprep.subr.bf16.mxu0 %v3160_v31  ;;  %2665 = vmatprep.subr.bf16.mxu1 %v3080_v47 }
 0x28d   :  { %2638 = vmatpush1.bf16.msra.mxu0 %v3163_v39  ;;  %2667 = vmatpush3.bf16.msra.mxu1 %v3243_v20 }
 0x28e   :  { %2640 = vmatprep.subr.bf16.mxu0 %v3166_v44  ;;  %2668 = vmatprep.subr.bf16.mxu1 %v3080_v47 }
 0x291   :  { %2642 = vmatpush1.bf16.msra.mxu0 %v3169_v52  ;;  %2670 = vmatpush3.bf16.msra.mxu1 %v3247_v24 }
 0x292   :  { %2644 = vmatprep.subr.bf16.mxu0 %v3172_v57  ;;  %2671 = vmatprep.subr.bf16.mxu1 %v3080_v47 }
 0x295   :  { %2646 = vmatpush1.bf16.msra.mxu0 %v3175_v1  ;;  %2673 = vmatpush3.bf16.msra.mxu1 %v3251_v28 }
 0x296   :  { %2648 = vmatprep.subr.bf16.mxu0 %v3178_v6  ;;  %2674 = vmatprep.subr.bf16.mxu1 %v3080_v47 }
 0x299   :  { %2650 = vmatpush1.bf16.msra.mxu0 %v3181_v15  ;;  %2676 = vmatpush3.bf16.msra.mxu1 %v3255_v33 }
 0x29a   :  { %2652 = vmatprep.subr.bf16.mxu0 %v3184_v21  ;;  %2677 = vmatprep.subr.bf16.mxu1 %v3080_v47 }
 0x29d   :  { %2654 = vmatpush1.bf16.msra.mxu0 %v3187_v29  ;;  %2679 = vmatpush3.bf16.msra.mxu1 %v3259_v37 }
 0x29e   :  { %2656 = vmatprep.subr.bf16.mxu0 %v3190_v34  ;;  %2680 = vmatprep.subr.bf16.mxu1 %v3080_v47 }
 0x2a1   :  { %2658 = vmatpush1.bf16.msra.mxu0 %v3193_v38  ;;  %2682 = vmatpush3.bf16.msra.mxu1 %v3263_v42 }
 0x2a2   :  { %2684 = vmatprep.subr.bf16.mxu0 %v3149_v8  ;;  %2715 = vmatprep.subr.bf16.mxu1 %v3080_v47 }
 0x357   :  { %v740_v46 = vpop.f32.mrb[4].mxu0  ;;  %v811_v48 = vpop.f32.mrb[8].mxu1 }
 0x358   :  { %v741_v49 = vadd.f32 %v740_v46, %v3293_v56  ;;  %v742_v50 = vpop.f32.mrb[5].mxu0  ;;  %v2207_v51 = vpop.f32.mrb[9].mxu1  ;;  %v812_v3 = vadd.f32 %v811_v48, %v3305_v19 }
 0x359   :  { %v743_v59 = vadd.f32 %v742_v50, %v3299_v4 }
 0x35a   :  { %v817_v53 = vrot.slane %v741_v49, 6  ;;  %v836_v7 = vrot.slane %v812_v3, 6 }
 0x35b   :  { %v818_v60 = vrot.slane %v743_v59, 6 }
 0x35c   :  { %v821_v54 = vadd.f32 %v817_v53, %v3295_v58 }
 0x35d   :  { %v822_v61 = vadd.f32 %v818_v60, %v3301_v5 }
 0x35e   :  { %v1885_v55 = vmul.f32 -1.442695, %v821_v54 }
 0x35f   :  { %v1886_v2 = vmul.f32 -1.442695, %v822_v61 }
 0x360   :  { %2943 = vpow2.f32 %v1885_v55 }
 0x36a   :  { %v2944_v62 = vpop.eup %2943 }
 0x36b   :  { %v826_v63 = vadd.f32 1.0, %v2944_v62 }
 0x36d   :  { %2945 = vrcp.f32 %v826_v63 }
 0x36e   :  { %2947 = vpow2.f32 %v1886_v2 }
 0x377   :  { %v2946_v9 = vpop.eup %2945 }
 0x378   :  { %v838_v10 = vmul.f32 %v2946_v9, %v836_v7  ;;  %v2948_v14 = vpop.eup %2947 }
 0x379   :  { %v832_v17 = vadd.f32 1.0, %v2948_v14 }
 0x37a   :  { %v839_v12 = vadd.f32 %v838_v10, %v3308_v35 }
 0x37c   :  { %2949 = vtanh.f32 %v839_v12 }
 0x37d   :  { %2951 = vrcp.f32 %v832_v17 }
 0x386   :  { %v2950_v22 = vpop.eup %2949 }
 0x387   :  { %v842_v23 = vrot.slane %v2950_v22, 1  ;;  %v2952_v30 = vpop.eup %2951 }
 0x389   :  { %v844_v25 = vsub.f32 %v3358_v43, %v842_v23 }
 0x38b   :  { %v846_v27 = vrot.slane %v844_v25, 7 }
 0x38d   :  { %v848_v32 = vmul.f32 %v2952_v30, %v846_v27 }
 0x38f   :  { %v3404_v36 = vadd.f32 %v2950_v22, %v848_v32 }
 0x391   :  { %850 = vst [vmem:[#allocation2] sm:$0x4] %v3404_v36  ;;  %v852_v40 = vrot.slane %v3404_v36, 2 }
 0x393   :  { %919 = vmatmul.mubr.f32.vlgmr.msra.gmra.mrb[6].mxu0 %v852_v40  ;;  %2241 = vmatmul.mubr.f32.vlgmr.msra.gmra.mrb[10].mxu1 %v852_v40 }
 0x394   :  { %2686 = vmatpush1.bf16.msra.mxu0 %v3151_v13  ;;  %2717 = vmatpush3.bf16.msra.mxu1 %v3230_v11 }
 0x395   :  { %2688 = vmatprep.subr.bf16.mxu0 %v3154_v18  ;;  %2718 = vmatprep.subr.bf16.mxu1 %v3080_v47 }
 0x396   :  { %1098 = vmatprep.mubr.f32.mxu0 %v3079_v0  ;;  %2275 = vmatprep.mubr.msk.f32.mxu1 %vm3081_vm0, %v3079_v0 }
 0x398   :  { %2690 = vmatpush1.bf16.msra.mxu0 %v3158_v26  ;;  %2720 = vmatpush3.bf16.msra.mxu1 %v3237_v16 }
 0x399   :  { %2692 = vmatprep.subr.bf16.mxu0 %v3160_v31  ;;  %2721 = vmatprep.subr.bf16.mxu1 %v3080_v47 }
 0x39c   :  { %2694 = vmatpush1.bf16.msra.mxu0 %v3163_v39  ;;  %2723 = vmatpush3.bf16.msra.mxu1 %v3243_v20 }
 0x39d   :  { %2696 = vmatprep.subr.bf16.mxu0 %v3166_v44  ;;  %2724 = vmatprep.subr.bf16.mxu1 %v3080_v47 }
 0x3a0   :  { %2698 = vmatpush1.bf16.msra.mxu0 %v3169_v52  ;;  %2726 = vmatpush3.bf16.msra.mxu1 %v3247_v24 }
 0x3a1   :  { %2700 = vmatprep.subr.bf16.mxu0 %v3172_v57  ;;  %2727 = vmatprep.subr.bf16.mxu1 %v3080_v47 }
 0x3a4   :  { %2702 = vmatpush1.bf16.msra.mxu0 %v3175_v1  ;;  %2729 = vmatpush3.bf16.msra.mxu1 %v3251_v28 }
 0x3a5   :  { %2704 = vmatprep.subr.bf16.mxu0 %v3178_v6  ;;  %2730 = vmatprep.subr.bf16.mxu1 %v3080_v47 }
 0x3a8   :  { %2706 = vmatpush1.bf16.msra.mxu0 %v3181_v15  ;;  %2732 = vmatpush3.bf16.msra.mxu1 %v3255_v33 }
 0x3a9   :  { %2708 = vmatprep.subr.bf16.mxu0 %v3184_v21  ;;  %2733 = vmatprep.subr.bf16.mxu1 %v3080_v47 }
 0x3ac   :  { %2710 = vmatpush1.bf16.msra.mxu0 %v3187_v29  ;;  %2735 = vmatpush3.bf16.msra.mxu1 %v3259_v37 }
 0x3ad   :  { %2712 = vmatprep.subr.bf16.mxu0 %v3190_v34  ;;  %2736 = vmatprep.subr.bf16.mxu1 %v3080_v47 }
 0x3b0   :  { %2714 = vmatpush1.bf16.msra.mxu0 %v3193_v38  ;;  %2738 = vmatpush3.bf16.msra.mxu1 %v3263_v42 }
 0x3b1   :  { %2740 = vmatprep.subr.bf16.mxu0 %v3149_v8  ;;  %2771 = vmatprep.subr.bf16.mxu1 %v3080_v47 }
 0x466   :  { %v920_v41 = vpop.f32.mrb[6].mxu0  ;;  %v991_v43 = vpop.f32.mrb[10].mxu1 }
 0x467   :  { %v921_v45 = vadd.f32 %v920_v41, %v3293_v56  ;;  %v922_v46 = vpop.f32.mrb[7].mxu0  ;;  %v2242_v48 = vpop.f32.mrb[11].mxu1  ;;  %v992_v62 = vadd.f32 %v991_v43, %v3305_v19 }
 0x468   :  { %v923_v53 = vadd.f32 %v922_v46, %v3299_v4 }
 0x469   :  { %v997_v49 = vrot.slane %v921_v45, 5  ;;  %v1016_v63 = vrot.slane %v992_v62, 5 }
 0x46a   :  { %v998_v54 = vrot.slane %v923_v53, 5 }
 0x46b   :  { %v1001_v50 = vadd.f32 %v997_v49, %v3295_v58 }
 0x46c   :  { %v1002_v55 = vadd.f32 %v998_v54, %v3301_v5 }
 0x46d   :  { %v1887_v51 = vmul.f32 -1.442695, %v1001_v50 }
 0x46e   :  { %v1888_v61 = vmul.f32 -1.442695, %v1002_v55 }
 0x46f   :  { %2953 = vpow2.f32 %v1887_v51 }
 0x479   :  { %v2954_v59 = vpop.eup %2953 }
 0x47a   :  { %v1006_v60 = vadd.f32 1.0, %v2954_v59 }
 0x47c   :  { %2955 = vrcp.f32 %v1006_v60 }
 0x47d   :  { %2957 = vpow2.f32 %v1888_v61 }
 0x486   :  { %v2956_v2 = vpop.eup %2955 }
 0x487   :  { %v1018_v3 = vmul.f32 %v2956_v2, %v1016_v63  ;;  %v2958_v9 = vpop.eup %2957 }
 0x488   :  { %v1012_v10 = vadd.f32 1.0, %v2958_v9 }
 0x489   :  { %v1019_v7 = vadd.f32 %v1018_v3, %v3308_v35 }
 0x48b   :  { %2959 = vtanh.f32 %v1019_v7 }
 0x48c   :  { %2961 = vrcp.f32 %v1012_v10 }
 0x495   :  { %v2960_v12 = vpop.eup %2959 }
 0x496   :  { %v1022_v14 = vrot.slane %v2960_v12, 1  ;;  %v2962_v23 = vpop.eup %2961 }
 0x498   :  { %v1024_v17 = vsub.f32 %v3404_v36, %v1022_v14 }
 0x49a   :  { %v1026_v22 = vrot.slane %v1024_v17, 7 }
 0x49c   :  { %v1028_v25 = vmul.f32 %v2962_v23, %v1026_v22 }
 0x49e   :  { %v3450_v27 = vadd.f32 %v2960_v12, %v1028_v25 }
 0x4a0   :  { %1030 = vst [vmem:[#allocation2] sm:$0x8] %v3450_v27  ;;  %v1032_v30 = vrot.slane %v3450_v27, 3 }
 0x4a2   :  { %1099 = vmatmul.mubr.f32.vlgmr.msra.gmra.mrb[8].mxu0 %v1032_v30  ;;  %2276 = vmatmul.mubr.f32.vlgmr.msra.gmra.mrb[12].mxu1 %v1032_v30 }
 0x4a3   :  { %2742 = vmatpush1.bf16.msra.mxu0 %v3151_v13  ;;  %2773 = vmatpush3.bf16.msra.mxu1 %v3230_v11 }
 0x4a4   :  { %2744 = vmatprep.subr.bf16.mxu0 %v3154_v18  ;;  %2774 = vmatprep.subr.bf16.mxu1 %v3080_v47 }
 0x4a5   :  { %1278 = vmatprep.mubr.f32.mxu0 %v3079_v0  ;;  %2310 = vmatprep.mubr.msk.f32.mxu1 %vm3081_vm0, %v3079_v0 }
 0x4a7   :  { %2746 = vmatpush1.bf16.msra.mxu0 %v3158_v26  ;;  %2776 = vmatpush3.bf16.msra.mxu1 %v3237_v16 }
 0x4a8   :  { %2748 = vmatprep.subr.bf16.mxu0 %v3160_v31  ;;  %2777 = vmatprep.subr.bf16.mxu1 %v3080_v47 }
 0x4ab   :  { %2750 = vmatpush1.bf16.msra.mxu0 %v3163_v39  ;;  %2779 = vmatpush3.bf16.msra.mxu1 %v3243_v20 }
 0x4ac   :  { %2752 = vmatprep.subr.bf16.mxu0 %v3166_v44  ;;  %2780 = vmatprep.subr.bf16.mxu1 %v3080_v47 }
 0x4af   :  { %2754 = vmatpush1.bf16.msra.mxu0 %v3169_v52  ;;  %2782 = vmatpush3.bf16.msra.mxu1 %v3247_v24 }
 0x4b0   :  { %2756 = vmatprep.subr.bf16.mxu0 %v3172_v57  ;;  %2783 = vmatprep.subr.bf16.mxu1 %v3080_v47 }
 0x4b3   :  { %2758 = vmatpush1.bf16.msra.mxu0 %v3175_v1  ;;  %2785 = vmatpush3.bf16.msra.mxu1 %v3251_v28 }
 0x4b4   :  { %2760 = vmatprep.subr.bf16.mxu0 %v3178_v6  ;;  %2786 = vmatprep.subr.bf16.mxu1 %v3080_v47 }
 0x4b7   :  { %2762 = vmatpush1.bf16.msra.mxu0 %v3181_v15  ;;  %2788 = vmatpush3.bf16.msra.mxu1 %v3255_v33 }
 0x4b8   :  { %2764 = vmatprep.subr.bf16.mxu0 %v3184_v21  ;;  %2789 = vmatprep.subr.bf16.mxu1 %v3080_v47 }
 0x4bb   :  { %2766 = vmatpush1.bf16.msra.mxu0 %v3187_v29  ;;  %2791 = vmatpush3.bf16.msra.mxu1 %v3259_v37 }
 0x4bc   :  { %2768 = vmatprep.subr.bf16.mxu0 %v3190_v34  ;;  %2792 = vmatprep.subr.bf16.mxu1 %v3080_v47 }
 0x4bf   :  { %2770 = vmatpush1.bf16.msra.mxu0 %v3193_v38  ;;  %2794 = vmatpush3.bf16.msra.mxu1 %v3263_v42 }
 0x4c0   :  { %2796 = vmatprep.subr.bf16.mxu0 %v3149_v8  ;;  %2827 = vmatprep.subr.bf16.mxu1 %v3080_v47 }
 0x575   :  { %v1100_v32 = vpop.f32.mrb[8].mxu0  ;;  %v1171_v36 = vpop.f32.mrb[12].mxu1 }
 0x576   :  { %v1101_v40 = vadd.f32 %v1100_v32, %v3293_v56  ;;  %v1102_v41 = vpop.f32.mrb[9].mxu0  ;;  %v2277_v43 = vpop.f32.mrb[13].mxu1  ;;  %v1172_v59 = vadd.f32 %v1171_v36, %v3305_v19 }
 0x577   :  { %v1103_v49 = vadd.f32 %v1102_v41, %v3299_v4 }
 0x578   :  { %v1177_v45 = vrot.slane %v1101_v40, 4  ;;  %v1196_v60 = vrot.slane %v1172_v59, 4 }
 0x579   :  { %v1178_v50 = vrot.slane %v1103_v49, 4 }
 0x57a   :  { %v1181_v46 = vadd.f32 %v1177_v45, %v3295_v58 }
 0x57b   :  { %v1182_v51 = vadd.f32 %v1178_v50, %v3301_v5 }
 0x57c   :  { %v1889_v48 = vmul.f32 -1.442695, %v1181_v46 }
 0x57d   :  { %v1890_v55 = vmul.f32 -1.442695, %v1182_v51 }
 0x57e   :  { %2963 = vpow2.f32 %v1889_v48 }
 0x588   :  { %v2964_v53 = vpop.eup %2963 }
 0x589   :  { %v1186_v54 = vadd.f32 1.0, %v2964_v53 }
 0x58b   :  { %2965 = vrcp.f32 %v1186_v54 }
 0x58c   :  { %2967 = vpow2.f32 %v1890_v55 }
 0x595   :  { %v2966_v61 = vpop.eup %2965 }
 0x596   :  { %v1198_v62 = vmul.f32 %v2966_v61, %v1196_v60  ;;  %v2968_v2 = vpop.eup %2967 }
 0x597   :  { %v1192_v3 = vadd.f32 1.0, %v2968_v2 }
 0x598   :  { %v1199_v63 = vadd.f32 %v1198_v62, %v3308_v35 }
 0x59a   :  { %2969 = vtanh.f32 %v1199_v63 }
 0x59b   :  { %2971 = vrcp.f32 %v1192_v3 }
 0x5a4   :  { %v2970_v7 = vpop.eup %2969 }
 0x5a5   :  { %v1202_v9 = vrot.slane %v2970_v7, 1  ;;  %v2972_v14 = vpop.eup %2971 }
 0x5a7   :  { %v1204_v10 = vsub.f32 %v3450_v27, %v1202_v9 }
 0x5a9   :  { %v1206_v12 = vrot.slane %v1204_v10, 7 }
 0x5ab   :  { %v1208_v17 = vmul.f32 %v2972_v14, %v1206_v12 }
 0x5ad   :  { %v3496_v22 = vadd.f32 %v2970_v7, %v1208_v17 }
 0x5af   :  { %1210 = vst [vmem:[#allocation2] sm:$0x10] %v3496_v22  ;;  %v1212_v23 = vrot.slane %v3496_v22, 4 }
 0x5b1   :  { %1279 = vmatmul.mubr.f32.vlgmr.msra.gmra.mrb[10].mxu0 %v1212_v23  ;;  %2311 = vmatmul.mubr.f32.vlgmr.msra.gmra.mrb[14].mxu1 %v1212_v23 }
 0x5b2   :  { %2798 = vmatpush1.bf16.msra.mxu0 %v3151_v13  ;;  %2829 = vmatpush3.bf16.msra.mxu1 %v3230_v11 }
 0x5b3   :  { %2800 = vmatprep.subr.bf16.mxu0 %v3154_v18  ;;  %2830 = vmatprep.subr.bf16.mxu1 %v3080_v47 }
 0x5b4   :  { %1458 = vmatprep.mubr.f32.mxu0 %v3079_v0  ;;  %2345 = vmatprep.mubr.msk.f32.mxu1 %vm3081_vm0, %v3079_v0 }
 0x5b6   :  { %2802 = vmatpush1.bf16.msra.mxu0 %v3158_v26  ;;  %2832 = vmatpush3.bf16.msra.mxu1 %v3237_v16 }
 0x5b7   :  { %2804 = vmatprep.subr.bf16.mxu0 %v3160_v31  ;;  %2833 = vmatprep.subr.bf16.mxu1 %v3080_v47 }
 0x5ba   :  { %2806 = vmatpush1.bf16.msra.mxu0 %v3163_v39  ;;  %2835 = vmatpush3.bf16.msra.mxu1 %v3243_v20 }
 0x5bb   :  { %2808 = vmatprep.subr.bf16.mxu0 %v3166_v44  ;;  %2836 = vmatprep.subr.bf16.mxu1 %v3080_v47 }
 0x5be   :  { %2810 = vmatpush1.bf16.msra.mxu0 %v3169_v52  ;;  %2838 = vmatpush3.bf16.msra.mxu1 %v3247_v24 }
 0x5bf   :  { %2812 = vmatprep.subr.bf16.mxu0 %v3172_v57  ;;  %2839 = vmatprep.subr.bf16.mxu1 %v3080_v47 }
 0x5c2   :  { %2814 = vmatpush1.bf16.msra.mxu0 %v3175_v1  ;;  %2841 = vmatpush3.bf16.msra.mxu1 %v3251_v28 }
 0x5c3   :  { %2816 = vmatprep.subr.bf16.mxu0 %v3178_v6  ;;  %2842 = vmatprep.subr.bf16.mxu1 %v3080_v47 }
 0x5c6   :  { %2818 = vmatpush1.bf16.msra.mxu0 %v3181_v15  ;;  %2844 = vmatpush3.bf16.msra.mxu1 %v3255_v33 }
 0x5c7   :  { %2820 = vmatprep.subr.bf16.mxu0 %v3184_v21  ;;  %2845 = vmatprep.subr.bf16.mxu1 %v3080_v47 }
 0x5ca   :  { %2822 = vmatpush1.bf16.msra.mxu0 %v3187_v29  ;;  %2847 = vmatpush3.bf16.msra.mxu1 %v3259_v37 }
 0x5cb   :  { %2824 = vmatprep.subr.bf16.mxu0 %v3190_v34  ;;  %2848 = vmatprep.subr.bf16.mxu1 %v3080_v47 }
 0x5ce   :  { %2826 = vmatpush1.bf16.msra.mxu0 %v3193_v38  ;;  %2850 = vmatpush3.bf16.msra.mxu1 %v3263_v42 }
 0x5cf   :  { %2852 = vmatprep.subr.bf16.mxu0 %v3149_v8  ;;  %2883 = vmatprep.subr.bf16.mxu1 %v3080_v47 }
 0x684   :  { %v1280_v25 = vpop.f32.mrb[10].mxu0  ;;  %v1351_v27 = vpop.f32.mrb[14].mxu1 }
 0x685   :  { %v1281_v30 = vadd.f32 %v1280_v25, %v3293_v56  ;;  %v1282_v32 = vpop.f32.mrb[11].mxu0  ;;  %v2312_v36 = vpop.f32.mrb[15].mxu1  ;;  %v1352_v51 = vadd.f32 %v1351_v27, %v3305_v19  ;;  %v2915_v27 = vld [vmem:[%s3646_s5] sm:$0xff]  }
 0x686   :  { %v1283_v45 = vadd.f32 %v1282_v32, %v3299_v4  ;;  %v2917_v32 = vld [vmem:[%s3646_s5 + $0x10] sm:$0xff]   ;;  %v2918_v36 = vld [vmem:[%s3646_s5 + $0x18] sm:$0xff]  }
 0x687   :  { %v1357_v40 = vrot.slane %v1281_v30, 3  ;;  %v1376_v53 = vrot.slane %v1352_v51, 3  ;;  %v2916_v30 = vld [vmem:[%s3646_s5 + $0x8] sm:$0xff]  }
 0x688   :  { %v1358_v46 = vrot.slane %v1283_v45, 3  ;;  %v2922_v45 = vld [vmem:[%s3646_s5 + $0x38] sm:$0xff]  }
 0x689   :  { %v1361_v41 = vadd.f32 %v1357_v40, %v3295_v58  ;;  %v2919_v40 = vld [vmem:[%s3646_s5 + $0x20] sm:$0xff]  }
 0x68a   :  { %v1362_v48 = vadd.f32 %v1358_v46, %v3301_v5 }
 0x68b   :  { %v1891_v43 = vmul.f32 -1.442695, %v1361_v41  ;;  %v2920_v41 = vld [vmem:[%s3646_s5 + $0x28] sm:$0xff]  }
 0x68c   :  { %v1892_v50 = vmul.f32 -1.442695, %v1362_v48 }
 0x68d   :  { %2973 = vpow2.f32 %v1891_v43  ;;  %v2921_v43 = vld [vmem:[%s3646_s5 + $0x30] sm:$0xff]  }
 0x697   :  { %v2974_v49 = vpop.eup %2973 }
 0x698   :  { %v1366_v8 = vadd.f32 1.0, %v2974_v49 }
 0x69a   :  { %2975 = vrcp.f32 %v1366_v8 }
 0x69b   :  { %2977 = vpow2.f32 %v1892_v50 }
 0x6a4   :  { %v2976_v54 = vpop.eup %2975 }
 0x6a5   :  { %v1378_v55 = vmul.f32 %v2976_v54, %v1376_v53  ;;  %v2978_v60 = vpop.eup %2977 }
 0x6a6   :  { %v1372_v61 = vadd.f32 1.0, %v2978_v60 }
 0x6a7   :  { %v1379_v59 = vadd.f32 %v1378_v55, %v3308_v35 }
 0x6a9   :  { %2979 = vtanh.f32 %v1379_v59 }
 0x6aa   :  { %2981 = vrcp.f32 %v1372_v61 }
 0x6b3   :  { %v2980_v62 = vpop.eup %2979 }
 0x6b4   :  { %v1382_v63 = vrot.slane %v2980_v62, 1  ;;  %v2982_v7 = vpop.eup %2981 }
 0x6b6   :  { %v1384_v2 = vsub.f32 %v3496_v22, %v1382_v63 }
 0x6b8   :  { %v1386_v3 = vrot.slane %v1384_v2, 7 }
 0x6ba   :  { %v1388_v9 = vmul.f32 %v2982_v7, %v1386_v3 }
 0x6bc   :  { %v3542_v10 = vadd.f32 %v2980_v62, %v1388_v9 }
 0x6be   :  { %1390 = vst [vmem:[#allocation2] sm:$0x20] %v3542_v10  ;;  %v1392_v12 = vrot.slane %v3542_v10, 5 }
 0x6c0   :  { %1459 = vmatmul.mubr.f32.vlgmr.msra.gmra.mrb[12].mxu0 %v1392_v12  ;;  %2346 = vmatmul.mubr.f32.vlgmr.msra.gmra.mrb[16].mxu1 %v1392_v12 }
 0x6c1   :  { %2854 = vmatpush1.bf16.msra.mxu0 %v3151_v13  ;;  %2885 = vmatpush3.bf16.msra.mxu1 %v3230_v11 }
 0x6c2   :  { %2856 = vmatprep.subr.bf16.mxu0 %v3154_v18  ;;  %2886 = vmatprep.subr.bf16.mxu1 %v3080_v47 }
 0x6c3   :  { %1638 = vmatprep.mubr.f32.mxu0 %v3079_v0  ;;  %2380 = vmatprep.mubr.msk.f32.mxu1 %vm3081_vm0, %v3079_v0 }
 0x6c5   :  { %2858 = vmatpush1.bf16.msra.mxu0 %v3158_v26  ;;  %2888 = vmatpush3.bf16.msra.mxu1 %v3237_v16 }
 0x6c6   :  { %2860 = vmatprep.subr.bf16.mxu0 %v3160_v31  ;;  %2889 = vmatprep.subr.bf16.mxu1 %v3080_v47 }
 0x6c9   :  { %2862 = vmatpush1.bf16.msra.mxu0 %v3163_v39  ;;  %2891 = vmatpush3.bf16.msra.mxu1 %v3243_v20 }
 0x6ca   :  { %2864 = vmatprep.subr.bf16.mxu0 %v3166_v44  ;;  %2892 = vmatprep.subr.bf16.mxu1 %v3080_v47 }
 0x6cd   :  { %2866 = vmatpush1.bf16.msra.mxu0 %v3169_v52  ;;  %2894 = vmatpush3.bf16.msra.mxu1 %v3247_v24 }
 0x6ce   :  { %2868 = vmatprep.subr.bf16.mxu0 %v3172_v57  ;;  %2895 = vmatprep.subr.bf16.mxu1 %v3080_v47 }
 0x6d1   :  { %2870 = vmatpush1.bf16.msra.mxu0 %v3175_v1  ;;  %2897 = vmatpush3.bf16.msra.mxu1 %v3251_v28 }
 0x6d2   :  { %2872 = vmatprep.subr.bf16.mxu0 %v3178_v6  ;;  %2898 = vmatprep.subr.bf16.mxu1 %v3080_v47 }
 0x6d5   :  { %2874 = vmatpush1.bf16.msra.mxu0 %v3181_v15  ;;  %2900 = vmatpush3.bf16.msra.mxu1 %v3255_v33 }
 0x6d6   :  { %2876 = vmatprep.subr.bf16.mxu0 %v3184_v21  ;;  %2901 = vmatprep.subr.bf16.mxu1 %v3080_v47 }
 0x6d9   :  { %2878 = vmatpush1.bf16.msra.mxu0 %v3187_v29  ;;  %2903 = vmatpush3.bf16.msra.mxu1 %v3259_v37 }
 0x6da   :  { %2880 = vmatprep.subr.bf16.mxu0 %v3190_v34  ;;  %2904 = vmatprep.subr.bf16.mxu1 %v3080_v47 }
 0x6dd   :  { %2882 = vmatpush1.bf16.msra.mxu0 %v3193_v38  ;;  %2906 = vmatpush3.bf16.msra.mxu1 %v3263_v42 }
 0x6de   :  { %2383 = vmatprep.subr.bf16.mxu0 %v3079_v0 }
 0x793   :  { %v1460_v13 = vpop.f32.mrb[12].mxu0  ;;  %v1531_v18 = vpop.f32.mrb[16].mxu1 }
 0x794   :  { %v1461_v26 = vadd.f32 %v1460_v13, %v3293_v56  ;;  %v1462_v31 = vpop.f32.mrb[13].mxu0  ;;  %v2347_v39 = vpop.f32.mrb[17].mxu1  ;;  %v1532_v38 = vadd.f32 %v1531_v18, %v3305_v19 }
 0x795   :  { %v1463_v1 = vadd.f32 %v1462_v31, %v3299_v4 }
 0x796   :  { %v1537_v44 = vrot.slane %v1461_v26, 2  ;;  %v1556_v47 = vrot.slane %v1532_v38, 2 }
 0x797   :  { %v1538_v6 = vrot.slane %v1463_v1, 2 }
 0x798   :  { %v1541_v52 = vadd.f32 %v1537_v44, %v3295_v58 }
 0x799   :  { %v1542_v15 = vadd.f32 %v1538_v6, %v3301_v5 }
 0x79a   :  { %v1893_v57 = vmul.f32 -1.442695, %v1541_v52 }
 0x79b   :  { %v1894_v34 = vmul.f32 -1.442695, %v1542_v15 }
 0x79c   :  { %2983 = vpow2.f32 %v1893_v57 }
 0x7a6   :  { %v2984_v21 = vpop.eup %2983 }
 0x7a7   :  { %v1546_v29 = vadd.f32 1.0, %v2984_v21 }
 0x7a9   :  { %2985 = vrcp.f32 %v1546_v29 }
 0x7aa   :  { %2987 = vpow2.f32 %v1894_v34 }
 0x7b3   :  { %v2986_v11 = vpop.eup %2985 }
 0x7b4   :  { %v1558_v16 = vmul.f32 %v2986_v11, %v1556_v47  ;;  %v2988_v24 = vpop.eup %2987 }
 0x7b5   :  { %v1552_v28 = vadd.f32 1.0, %v2988_v24 }
 0x7b6   :  { %v1559_v20 = vadd.f32 %v1558_v16, %v3308_v35 }
 0x7b8   :  { %2989 = vtanh.f32 %v1559_v20 }
 0x7b9   :  { %2991 = vrcp.f32 %v1552_v28 }
 0x7c2   :  { %v2990_v33 = vpop.eup %2989 }
 0x7c3   :  { %v1562_v37 = vrot.slane %v2990_v33, 1  ;;  %v2992_v17 = vpop.eup %2991 }
 0x7c5   :  { %v1564_v42 = vsub.f32 %v3542_v10, %v1562_v37 }
 0x7c7   :  { %v1566_v14 = vrot.slane %v1564_v42, 7 }
 0x7c9   :  { %v1568_v22 = vmul.f32 %v2992_v17, %v1566_v14 }
 0x7cb   :  { %v1569_v23 = vadd.f32 %v2990_v33, %v1568_v22 }
 0x7cd   :  { %1570 = vst [vmem:[#allocation2] sm:$0x40] %v1569_v23  ;;  %v1572_v25 = vrot.slane %v1569_v23, 6 }
 0x7cf   :  { %1639 = vmatmul.mubr.f32.vlgmr.msra.gmra.mrb[14].mxu0 %v1572_v25  ;;  %2381 = vmatmul.mubr.f32.vlgmr.msra.gmra.mrb[18].mxu1 %v1572_v25 }
 0x7d0   :  { %2399 = vmatprep.mubr.msk.bf16.mxu0 %vm3081_vm0, %v3079_v0  ;;  %2384 = vmatpush3.bf16.msra.mxu0 %v2915_v27 }
 0x7d1   :  { %2385 = vmatprep.subr.bf16.mxu0 %v3079_v0 }
 0x7d4   :  { %2386 = vmatpush3.bf16.msra.mxu0 %v2916_v30 }
 0x7d5   :  { %2387 = vmatprep.subr.bf16.mxu0 %v3079_v0 }
 0x7d8   :  { %2388 = vmatpush3.bf16.msra.mxu0 %v2917_v32 }
 0x7d9   :  { %2389 = vmatprep.subr.bf16.mxu0 %v3079_v0 }
 0x7dc   :  { %2390 = vmatpush3.bf16.msra.mxu0 %v2918_v36 }
 0x7dd   :  { %2391 = vmatprep.subr.bf16.mxu0 %v3079_v0 }
 0x7e0   :  { %2392 = vmatpush3.bf16.msra.mxu0 %v2919_v40 }
 0x7e1   :  { %2393 = vmatprep.subr.bf16.mxu0 %v3079_v0 }
 0x7e4   :  { %2394 = vmatpush3.bf16.msra.mxu0 %v2920_v41 }
 0x7e5   :  { %2395 = vmatprep.subr.bf16.mxu0 %v3079_v0 }
 0x7e8   :  { %2396 = vmatpush3.bf16.msra.mxu0 %v2921_v43 }
 0x7e9   :  { %2397 = vmatprep.subr.bf16.mxu0 %v3079_v0 }
 0x7ec   :  { %2398 = vmatpush3.bf16.msra.mxu0 %v2922_v45 }
 0x8a2   :  { %v1640_v46 = vpop.f32.mrb[14].mxu0  ;;  %v1711_v48 = vpop.f32.mrb[18].mxu1 }
 0x8a3   :  { %v1641_v49 = vadd.f32 %v1640_v46, %v3293_v56  ;;  %v1642_v8 = vpop.f32.mrb[15].mxu0  ;;  %v2382_v50 = vpop.f32.mrb[19].mxu1  ;;  %v1712_v63 = vadd.f32 %v1711_v48, %v3305_v19  ;;  %v1897_v19 = vld [vmem:[%s3647_s6] ss:$0 sm:$0xff] }
 0x8a4   :  { %v1643_v55 = vadd.f32 %v1642_v8, %v3299_v4 }
 0x8a5   :  { %v1717_v51 = vrot.slane %v1641_v49, 1  ;;  %v1736_v56 = vrot.slane %v1712_v63, 1 }
 0x8a6   :  { %v1718_v59 = vrot.slane %v1643_v55, 1 }
 0x8a7   :  { %v1721_v53 = vadd.f32 %v1717_v51, %v3295_v58 }
 0x8a8   :  { %v1722_v60 = vadd.f32 %v1718_v59, %v3301_v5 }
 0x8a9   :  { %v1895_v54 = vmul.f32 -1.442695, %v1721_v53 }
 0x8aa   :  { %v1896_v0 = vmul.f32 -1.442695, %v1722_v60 }
 0x8ab   :  { %2993 = vpow2.f32 %v1895_v54 }
 0x8b5   :  { %v2994_v61 = vpop.eup %2993 }
 0x8b6   :  { %v1726_v62 = vadd.f32 1.0, %v2994_v61 }
 0x8b8   :  { %2995 = vrcp.f32 %v1726_v62 }
 0x8b9   :  { %2997 = vpow2.f32 %v1896_v0 }
 0x8c2   :  { %v2996_v2 = vpop.eup %2995 }
 0x8c3   :  { %v1738_v3 = vmul.f32 %v2996_v2, %v1736_v56  ;;  %v2998_v58 = vpop.eup %2997 }
 0x8c4   :  { %v1732_v9 = vadd.f32 1.0, %v2998_v58 }
 0x8c5   :  { %v1739_v7 = vadd.f32 %v1738_v3, %v3308_v35 }
 0x8c7   :  { %2999 = vtanh.f32 %v1739_v7 }
 0x8c8   :  { %3001 = vrcp.f32 %v1732_v9 }
 0x8d1   :  { %v3000_v4 = vpop.eup %2999 }
 0x8d2   :  { %v1742_v10 = vrot.slane %v3000_v4, 1  ;;  %v3002_v13 = vpop.eup %3001 }
 0x8d4   :  { %v1744_v12 = vsub.f32 %v1569_v23, %v1742_v10 }
 0x8d6   :  { %v1746_v5 = vrot.slane %v1744_v12, 7 }
 0x8d8   :  { %v1748_v18 = vmul.f32 %v3002_v13, %v1746_v5 }
 0x8da   :  { %v1749_v26 = vadd.f32 %v3000_v4, %v1748_v18 }
 0x8dc   :  { %1750 = vst [vmem:[#allocation2] sm:$0x80] %v1749_v26 }
 0x8e3   :  { %v1751_v31 = vld [vmem:[#allocation2] sm:$0xff] }
 0x8e4   :  { %v1752_v39 = vpack.c.bf16 %v1751_v31, %v1751_v31 }
 0x8e6   :  { %2400 = vmatmul.mubr.bf16.vlgmr.msra.gmra.mrb[16].mxu0 %v1752_v39 }
 0x9b9   :  { %v1858_v35 = vpop.f32.mrb[16].mxu0 }
 0x9ba   :  { %v1859_v44 = vadd.f32 %v1897_v19, %v1858_v35  ;;  %v2401_v52 = vpop.f32.mrb[17].mxu0 }
 0x9bb   :  { %v1861_v57 = vpop.f32.mrb[18].mxu0 }
 0x9bc   :  { %1864 = vst [vmem:[#allocation8] sm:$0xff] %v1859_v44  ;;  %v2402_v1 = vpop.f32.mrb[19].mxu0 }
 0x9bd   :  { %3058 = shalt.err (!%p3055_p6)
}
 0x9be   :  { %s3059_s6 = scalar_lea.hbm %s3648_s7, 128 }
 0x9bf   :  { %p3060_p7 = scmp.ne.s32.totalorder %s3648_s7, %s3059_s6  ;;  %p3063_p8 = scmp.lt.u32.totalorder %s3059_s6, %s3648_s7 }
 0x9c1   :  { %p3065_p9 = pnand %p3063_p8, %p3060_p7 }
 0x9c3   :  { %3068 = shalt.err (!%p3065_p9)
}
 0x9c4   :  { %1874 = dma.vmem_to_hbm [thread:$0]  %s1872_s23, 128, %s3648_s7, [#allocation5]  }
 0x9c5   :  { %3073 = dma.done.wait [#allocation5], 128  }
 0x9c6   :  { %3074 = vsyncadd [#allocation5], 4294967168 }
 0x9c7   :  { %1878 = vsyncpa [#allocation4], 1 }
 0x9c8   :  { %1879 = vsyncpa [#allocation7], 1 }
 0x9c9   :  { %1880 = vsyncpa [#allocation5], 1 }

</bundles_post_ra>
